<compile_context>
chip_gen: v6e
topology: v6e:2x2x1
jax: 0.10.0
libtpu: 0.0.40
codegen_flags: <defaults>
</compile_context>

<pallas_src>
import functools

import jax
import jax.numpy as jnp
from jax.experimental import pallas as pl
from jax.experimental.pallas import tpu as pltpu


def _round_up(x, m):
    return (x + m - 1) // m * m


def _lstm_dense_logsoftmax_kernel(emb_ref, wih_ref, whh_ref, b_ref,
                                  wd_ref, bd_ref, out_ref, xp_ref, hs_ref,
                                  *, T, Bp):
    Hp = whh_ref.shape[0]          # padded hidden size (multiple of 128)

    # ---- 1. Input projection for all time steps at once (single MXU matmul) ----
    xp_ref[...] = (jnp.dot(emb_ref[...], wih_ref[...],
                           preferred_element_type=jnp.float32)
                   + b_ref[...])                                  # (T*Bp, 4Hp) f32

    whh = whh_ref[...]                                            # (Hp, 4Hp) bf16, hoisted

    # ---- 2. LSTM recurrence (unrolled; per step only h @ W_hh on the MXU) ----
    def step(t, carry):
        h_bf, c = carry                                           # (Bp,Hp) bf16 / f32
        off = pl.multiple_of(t * Bp, Bp)
        gates = (xp_ref[pl.ds(off, Bp), :]
                 + jnp.dot(h_bf, whh, preferred_element_type=jnp.float32))
        # PyTorch gate order i, f, g, o; each gate is a lane-aligned 128-wide block.
        i_g = jax.nn.sigmoid(gates[:, 0:Hp])
        f_g = jax.nn.sigmoid(gates[:, Hp:2 * Hp])
        g_g = jnp.tanh(gates[:, 2 * Hp:3 * Hp])
        o_g = jax.nn.sigmoid(gates[:, 3 * Hp:4 * Hp])
        c_new = f_g * c + i_g * g_g
        h_new = o_g * jnp.tanh(c_new)
        hs_ref[pl.ds(off, Bp), :] = h_new                         # f32 slab, 8-row aligned
        return (h_new.astype(jnp.bfloat16), c_new)

    h0 = jnp.zeros((Bp, Hp), jnp.bfloat16)
    c0 = jnp.zeros((Bp, Hp), jnp.float32)
    jax.lax.fori_loop(0, T, step, (h0, c0), unroll=True)

    # ---- 3. Dense + log_softmax over all time steps (lane-dense, Cp = 128k) ----
    hs_bf = hs_ref[...].astype(jnp.bfloat16)                      # (T*Bp, Hp)
    logits = (jnp.dot(hs_bf, wd_ref[...], preferred_element_type=jnp.float32)
              + bd_ref[...])                                      # (T*Bp, Cp)
    m = jnp.max(logits, axis=-1, keepdims=True)
    lse = jnp.log(jnp.sum(jnp.exp(logits - m), axis=-1, keepdims=True)) + m
    out_ref[...] = logits - lse                                   # full-width stores


def ner_tagger_forward(X, params):
    """X: int32 (B, T) token ids -> float32 (B, T, C) log-probabilities."""
    emb_table = params["emb_table"]           # (V, E)
    w_ih = params["w_ih"]                     # (4H, E)
    w_hh = params["w_hh"]                     # (4H, H)
    b_ih = params["b_ih"]                     # (4H,)
    b_hh = params["b_hh"]                     # (4H,)
    w_d = params["w_d"]                       # (C, H)
    b_d = params["b_d"]                       # (C,)

    B, T = X.shape
    E = emb_table.shape[1]
    H = w_hh.shape[1]
    C = w_d.shape[0]

    Bp = _round_up(B, 8)                      # sublane alignment
    Hp = _round_up(H, 128)                    # per-gate lane alignment
    Cp = _round_up(C, 128)                    # lane-dense output

    # ---- glue: embedding gather + padding / layout / weight re-packing ----
    embedded = jnp.take(emb_table, X, axis=0)                       # (B, T, E)
    emb = jnp.zeros((Bp, T, E), jnp.float32).at[:B].set(embedded)
    emb_tm = (jnp.transpose(emb, (1, 0, 2))                         # (T, Bp, E)
              .reshape(T * Bp, E).astype(jnp.bfloat16))

    # gate-wise padding H -> Hp so each gate occupies its own 128-lane block
    w_ih4 = w_ih.reshape(4, H, E)
    wih_p = jnp.zeros((4, Hp, E), jnp.float32).at[:, :H, :].set(w_ih4)
    wih_t = jnp.transpose(wih_p, (2, 0, 1)).reshape(E, 4 * Hp).astype(jnp.bfloat16)

    w_hh4 = w_hh.reshape(4, H, H)
    whh_p = jnp.zeros((4, Hp, Hp), jnp.float32).at[:, :H, :H].set(w_hh4)
    whh_t = jnp.transpose(whh_p, (2, 0, 1)).reshape(Hp, 4 * Hp).astype(jnp.bfloat16)

    b4 = (b_ih + b_hh).astype(jnp.float32).reshape(4, H)
    b_p = jnp.zeros((4, Hp), jnp.float32).at[:, :H].set(b4).reshape(1, 4 * Hp)

    wd_t = (jnp.zeros((Hp, Cp), jnp.float32).at[:H, :C].set(w_d.T)
            .astype(jnp.bfloat16))
    # padded class columns get a -1e9 bias so they vanish from the log_softmax
    bd_p = jnp.full((1, Cp), -1e9, jnp.float32).at[0, :C].set(b_d)

    vmem = pl.BlockSpec(memory_space=pltpu.MemorySpace.VMEM)
    kernel = functools.partial(_lstm_dense_logsoftmax_kernel, T=T, Bp=Bp)

    # TODO(synk): for large B add a batch grid axis (dimension_semantics=("parallel",))
    # to shard sequences across the two v7x TensorCores; at B=2 a single call is best.
    out2d = pl.pallas_call(
        kernel,
        out_shape=jax.ShapeDtypeStruct((T * Bp, Cp), jnp.float32),
        in_specs=[vmem] * 6,
        out_specs=vmem,
        scratch_shapes=[pltpu.VMEM((T * Bp, 4 * Hp), jnp.float32),   # x-projection
                        pltpu.VMEM((T * Bp, Hp), jnp.float32)],      # hidden states
    )(emb_tm, wih_t, whh_t, b_p, wd_t, bd_p)                         # (T*Bp, Cp)

    out = out2d.reshape(T, Bp, Cp)[:, :B, :C]                        # drop padding
    return jnp.transpose(out, (1, 0, 2))                             # (B, T, C)


def reference_forward(X, params):
    """Pure-JAX f32 reference mirroring torch semantics (for correctness check)."""
    emb = jnp.take(params["emb_table"], X, axis=0)            # (B, T, E)
    H = params["w_hh"].shape[1]
    w_ih, w_hh = params["w_ih"], params["w_hh"]
    b = params["b_ih"] + params["b_hh"]

    def cell(carry, x_t):
        h, c = carry
        gates = x_t @ w_ih.T + h @ w_hh.T + b
        i_g = jax.nn.sigmoid(gates[:, 0:H])
        f_g = jax.nn.sigmoid(gates[:, H:2 * H])
        g_g = jnp.tanh(gates[:, 2 * H:3 * H])
        o_g = jax.nn.sigmoid(gates[:, 3 * H:4 * H])
        c_new = f_g * c + i_g * g_g
        h_new = o_g * jnp.tanh(c_new)
        return (h_new, c_new), h_new

    B = X.shape[0]
    init = (jnp.zeros((B, H), jnp.float32), jnp.zeros((B, H), jnp.float32))
    _, hs = jax.lax.scan(cell, init, jnp.transpose(emb, (1, 0, 2)))   # (T, B, H)
    hs = jnp.transpose(hs, (1, 0, 2))                                 # (B, T, H)
    logits = hs @ params["w_d"].T + params["b_d"]
    return jax.nn.log_softmax(logits, axis=-1)


if __name__ == "__main__":
    vocab_size = 50
    embedding_size = 32                    # E
    dense_output_size = 8                  # C (number of NER tags)
    H = embedding_size // 2                # LSTM hidden size
    B, T = 2, 8                            # batch, sequence length

    key = jax.random.PRNGKey(0)
    keys = jax.random.split(key, 8)
    params = {
        "emb_table": 0.1 * jax.random.normal(keys[0], (vocab_size, embedding_size), jnp.float32),
        "w_ih": 0.1 * jax.random.normal(keys[1], (4 * H, embedding_size), jnp.float32),
        "w_hh": 0.1 * jax.random.normal(keys[2], (4 * H, H), jnp.float32),
        "b_ih": 0.1 * jax.random.normal(keys[3], (4 * H,), jnp.float32),
        "b_hh": 0.1 * jax.random.normal(keys[4], (4 * H,), jnp.float32),
        "w_d": 0.1 * jax.random.normal(keys[5], (dense_output_size, H), jnp.float32),
        "b_d": 0.1 * jax.random.normal(keys[6], (dense_output_size,), jnp.float32),
    }
    X = jax.random.randint(keys[7], (B, T), 0, vocab_size, dtype=jnp.int32)

    out = jax.block_until_ready(ner_tagger_forward(X, params))
    ref = reference_forward(X, params)

    assert out.shape == (B, T, dense_output_size), out.shape
    # bf16 MXU inputs (f32 accumulation) -> slightly looser tolerance than pure f32
    assert jnp.allclose(out, ref, atol=2e-2, rtol=2e-2), "kernel mismatch vs JAX reference"
    print("KERNEL_OK")
</pallas_src>

<mosaic_0001>
module attributes {stable_mosaic.version = 11 : i64} {
  func.func @_lstm_dense_logsoftmax_kernel(%arg0: memref<64x32xbf16, #tpu.memory_space<vmem>>, %arg1: memref<32x512xbf16, #tpu.memory_space<vmem>>, %arg2: memref<128x512xbf16, #tpu.memory_space<vmem>>, %arg3: memref<1x512xf32, #tpu.memory_space<vmem>>, %arg4: memref<128x128xbf16, #tpu.memory_space<vmem>>, %arg5: memref<1x128xf32, #tpu.memory_space<vmem>>, %arg6: memref<64x128xf32, #tpu.memory_space<vmem>>, %arg7: memref<64x512xf32, #tpu.memory_space<vmem>>, %arg8: memref<64x128xf32, #tpu.memory_space<vmem>>) attributes {dimension_semantics = [], scalar_prefetch = 0 : i64, scratch_operands = 2 : i64, tpu.core_type = #tpu.core_type<tc>} {
    %c0 = arith.constant 0 : index
    %c0_0 = arith.constant 0 : index
    %0 = vector.load %arg0[%c0, %c0_0] : memref<64x32xbf16, #tpu.memory_space<vmem>>, vector<64x32xbf16>
    %c0_1 = arith.constant 0 : index
    %c0_2 = arith.constant 0 : index
    %1 = vector.load %arg1[%c0_1, %c0_2] : memref<32x512xbf16, #tpu.memory_space<vmem>>, vector<32x512xbf16>
    %cst = arith.constant dense<0.000000e+00> : vector<64x512xf32>
    %2 = tpu.matmul %0, %1, %cst {dimension_numbers = #tpu.dot_dimension_numbers<[1], [0], [0], [1], [0, 0, 1, 1], [], []>} : vector<64x32xbf16>, vector<32x512xbf16>, vector<64x512xf32> -> vector<64x512xf32>
    %c0_3 = arith.constant 0 : index
    %c0_4 = arith.constant 0 : index
    %3 = vector.load %arg3[%c0_3, %c0_4] : memref<1x512xf32, #tpu.memory_space<vmem>>, vector<1x512xf32>
    %4 = vector.broadcast %3 : vector<1x512xf32> to vector<64x512xf32>
    %5 = arith.addf %2, %4 : vector<64x512xf32>
    %c0_5 = arith.constant 0 : index
    %c0_6 = arith.constant 0 : index
    %6 = vector.load %arg7[%c0_5, %c0_6] : memref<64x512xf32, #tpu.memory_space<vmem>>, vector<64x512xf32>
    tpu.vector_store %arg7[%c0_5, %c0_6], %5 {strides = array<i32>} : memref<64x512xf32, #tpu.memory_space<vmem>>, vector<64x512xf32>,
    %c0_7 = arith.constant 0 : index
    %c0_8 = arith.constant 0 : index
    %7 = vector.load %arg2[%c0_7, %c0_8] : memref<128x512xbf16, #tpu.memory_space<vmem>>, vector<128x512xbf16>
    %cst_9 = arith.constant 0.000000e+00 : bf16
    %8 = vector.broadcast %cst_9 : bf16 to vector<8x128xbf16>
    %cst_10 = arith.constant 0.000000e+00 : f32
    %9 = vector.broadcast %cst_10 : f32 to vector<8x128xf32>
    %c0_i32 = arith.constant 0 : i32
    %c8_i32 = arith.constant 8 : i32
    %10 = arith.muli %c0_i32, %c8_i32 : i32
    %11 = tpu.assume_multiple %10, 8 : i32
    %12 = arith.index_cast %11 : i32 to index
    %c0_11 = arith.constant 0 : index
    %13 = vector.load %arg7[%12, %c0_11] : memref<64x512xf32, #tpu.memory_space<vmem>>, vector<8x512xf32>
    %cst_12 = arith.constant dense<0.000000e+00> : vector<8x512xf32>
    %14 = tpu.matmul %8, %7, %cst_12 {dimension_numbers = #tpu.dot_dimension_numbers<[1], [0], [0], [1], [0, 0, 1, 1], [], []>} : vector<8x128xbf16>, vector<128x512xbf16>, vector<8x512xf32> -> vector<8x512xf32>
    %15 = arith.addf %13, %14 : vector<8x512xf32>
    %16 = vector.extract_strided_slice %15 {offsets = [0, 0], sizes = [8, 128], strides = [1, 1]} : vector<8x512xf32> to vector<8x128xf32>
    %17 = arith.negf %16 : vector<8x128xf32>
    %18 = math.exp %17 : vector<8x128xf32>
    %cst_13 = arith.constant 1.000000e+00 : f32
    %19 = vector.broadcast %cst_13 : f32 to vector<8x128xf32>
    %20 = arith.addf %19, %18 : vector<8x128xf32>
    %21 = arith.divf %19, %20 : vector<8x128xf32>
    %22 = vector.extract_strided_slice %15 {offsets = [0, 128], sizes = [8, 128], strides = [1, 1]} : vector<8x512xf32> to vector<8x128xf32>
    %23 = arith.negf %22 : vector<8x128xf32>
    %24 = math.exp %23 : vector<8x128xf32>
    %cst_14 = arith.constant 1.000000e+00 : f32
    %25 = vector.broadcast %cst_14 : f32 to vector<8x128xf32>
    %26 = arith.addf %25, %24 : vector<8x128xf32>
    %27 = arith.divf %25, %26 : vector<8x128xf32>
    %28 = vector.extract_strided_slice %15 {offsets = [0, 256], sizes = [8, 128], strides = [1, 1]} : vector<8x512xf32> to vector<8x128xf32>
    %29 = math.tanh %28 : vector<8x128xf32>
    %30 = vector.extract_strided_slice %15 {offsets = [0, 384], sizes = [8, 128], strides = [1, 1]} : vector<8x512xf32> to vector<8x128xf32>
    %31 = arith.negf %30 : vector<8x128xf32>
    %32 = math.exp %31 : vector<8x128xf32>
    %cst_15 = arith.constant 1.000000e+00 : f32
    %33 = vector.broadcast %cst_15 : f32 to vector<8x128xf32>
    %34 = arith.addf %33, %32 : vector<8x128xf32>
    %35 = arith.divf %33, %34 : vector<8x128xf32>
    %36 = arith.mulf %27, %9 : vector<8x128xf32>
    %37 = arith.mulf %21, %29 : vector<8x128xf32>
    %38 = arith.addf %36, %37 : vector<8x128xf32>
    %39 = math.tanh %38 : vector<8x128xf32>
    %40 = arith.mulf %35, %39 : vector<8x128xf32>
    %41 = arith.index_cast %11 : i32 to index
    %c0_16 = arith.constant 0 : index
    %42 = vector.load %arg8[%41, %c0_16] : memref<64x128xf32, #tpu.memory_space<vmem>>, vector<8x128xf32>
    tpu.vector_store %arg8[%41, %c0_16], %40 {strides = array<i32>} : memref<64x128xf32, #tpu.memory_space<vmem>>, vector<8x128xf32>,
    %43 = arith.truncf %40 : vector<8x128xf32> to vector<8x128xbf16>
    %c1_i32 = arith.constant 1 : i32
    %c8_i32_17 = arith.constant 8 : i32
    %44 = arith.muli %c1_i32, %c8_i32_17 : i32
    %45 = tpu.assume_multiple %44, 8 : i32
    %46 = arith.index_cast %45 : i32 to index
    %c0_18 = arith.constant 0 : index
    %47 = vector.load %arg7[%46, %c0_18] : memref<64x512xf32, #tpu.memory_space<vmem>>, vector<8x512xf32>
    %cst_19 = arith.constant dense<0.000000e+00> : vector<8x512xf32>
    %48 = tpu.matmul %43, %7, %cst_19 {dimension_numbers = #tpu.dot_dimension_numbers<[1], [0], [0], [1], [0, 0, 1, 1], [], []>} : vector<8x128xbf16>, vector<128x512xbf16>, vector<8x512xf32> -> vector<8x512xf32>
    %49 = arith.addf %47, %48 : vector<8x512xf32>
    %50 = vector.extract_strided_slice %49 {offsets = [0, 0], sizes = [8, 128], strides = [1, 1]} : vector<8x512xf32> to vector<8x128xf32>
    %51 = arith.negf %50 : vector<8x128xf32>
    %52 = math.exp %51 : vector<8x128xf32>
    %cst_20 = arith.constant 1.000000e+00 : f32
    %53 = vector.broadcast %cst_20 : f32 to vector<8x128xf32>
    %54 = arith.addf %53, %52 : vector<8x128xf32>
    %55 = arith.divf %53, %54 : vector<8x128xf32>
    %56 = vector.extract_strided_slice %49 {offsets = [0, 128], sizes = [8, 128], strides = [1, 1]} : vector<8x512xf32> to vector<8x128xf32>
    %57 = arith.negf %56 : vector<8x128xf32>
    %58 = math.exp %57 : vector<8x128xf32>
    %cst_21 = arith.constant 1.000000e+00 : f32
    %59 = vector.broadcast %cst_21 : f32 to vector<8x128xf32>
    %60 = arith.addf %59, %58 : vector<8x128xf32>
    %61 = arith.divf %59, %60 : vector<8x128xf32>
    %62 = vector.extract_strided_slice %49 {offsets = [0, 256], sizes = [8, 128], strides = [1, 1]} : vector<8x512xf32> to vector<8x128xf32>
    %63 = math.tanh %62 : vector<8x128xf32>
    %64 = vector.extract_strided_slice %49 {offsets = [0, 384], sizes = [8, 128], strides = [1, 1]} : vector<8x512xf32> to vector<8x128xf32>
    %65 = arith.negf %64 : vector<8x128xf32>
    %66 = math.exp %65 : vector<8x128xf32>
    %cst_22 = arith.constant 1.000000e+00 : f32
    %67 = vector.broadcast %cst_22 : f32 to vector<8x128xf32>
    %68 = arith.addf %67, %66 : vector<8x128xf32>
    %69 = arith.divf %67, %68 : vector<8x128xf32>
    %70 = arith.mulf %61, %38 : vector<8x128xf32>
    %71 = arith.mulf %55, %63 : vector<8x128xf32>
    %72 = arith.addf %70, %71 : vector<8x128xf32>
    %73 = math.tanh %72 : vector<8x128xf32>
    %74 = arith.mulf %69, %73 : vector<8x128xf32>
    %75 = arith.index_cast %45 : i32 to index
    %c0_23 = arith.constant 0 : index
    %76 = vector.load %arg8[%75, %c0_23] : memref<64x128xf32, #tpu.memory_space<vmem>>, vector<8x128xf32>
    tpu.vector_store %arg8[%75, %c0_23], %74 {strides = array<i32>} : memref<64x128xf32, #tpu.memory_space<vmem>>, vector<8x128xf32>,
    %77 = arith.truncf %74 : vector<8x128xf32> to vector<8x128xbf16>
    %c2_i32 = arith.constant 2 : i32
    %c8_i32_24 = arith.constant 8 : i32
    %78 = arith.muli %c2_i32, %c8_i32_24 : i32
    %79 = tpu.assume_multiple %78, 8 : i32
    %80 = arith.index_cast %79 : i32 to index
    %c0_25 = arith.constant 0 : index
    %81 = vector.load %arg7[%80, %c0_25] : memref<64x512xf32, #tpu.memory_space<vmem>>, vector<8x512xf32>
    %cst_26 = arith.constant dense<0.000000e+00> : vector<8x512xf32>
    %82 = tpu.matmul %77, %7, %cst_26 {dimension_numbers = #tpu.dot_dimension_numbers<[1], [0], [0], [1], [0, 0, 1, 1], [], []>} : vector<8x128xbf16>, vector<128x512xbf16>, vector<8x512xf32> -> vector<8x512xf32>
    %83 = arith.addf %81, %82 : vector<8x512xf32>
    %84 = vector.extract_strided_slice %83 {offsets = [0, 0], sizes = [8, 128], strides = [1, 1]} : vector<8x512xf32> to vector<8x128xf32>
    %85 = arith.negf %84 : vector<8x128xf32>
    %86 = math.exp %85 : vector<8x128xf32>
    %cst_27 = arith.constant 1.000000e+00 : f32
    %87 = vector.broadcast %cst_27 : f32 to vector<8x128xf32>
    %88 = arith.addf %87, %86 : vector<8x128xf32>
    %89 = arith.divf %87, %88 : vector<8x128xf32>
    %90 = vector.extract_strided_slice %83 {offsets = [0, 128], sizes = [8, 128], strides = [1, 1]} : vector<8x512xf32> to vector<8x128xf32>
    %91 = arith.negf %90 : vector<8x128xf32>
    %92 = math.exp %91 : vector<8x128xf32>
    %cst_28 = arith.constant 1.000000e+00 : f32
    %93 = vector.broadcast %cst_28 : f32 to vector<8x128xf32>
    %94 = arith.addf %93, %92 : vector<8x128xf32>
    %95 = arith.divf %93, %94 : vector<8x128xf32>
    %96 = vector.extract_strided_slice %83 {offsets = [0, 256], sizes = [8, 128], strides = [1, 1]} : vector<8x512xf32> to vector<8x128xf32>
    %97 = math.tanh %96 : vector<8x128xf32>
    %98 = vector.extract_strided_slice %83 {offsets = [0, 384], sizes = [8, 128], strides = [1, 1]} : vector<8x512xf32> to vector<8x128xf32>
    %99 = arith.negf %98 : vector<8x128xf32>
    %100 = math.exp %99 : vector<8x128xf32>
    %cst_29 = arith.constant 1.000000e+00 : f32
    %101 = vector.broadcast %cst_29 : f32 to vector<8x128xf32>
    %102 = arith.addf %101, %100 : vector<8x128xf32>
    %103 = arith.divf %101, %102 : vector<8x128xf32>
    %104 = arith.mulf %95, %72 : vector<8x128xf32>
    %105 = arith.mulf %89, %97 : vector<8x128xf32>
    %106 = arith.addf %104, %105 : vector<8x128xf32>
    %107 = math.tanh %106 : vector<8x128xf32>
    %108 = arith.mulf %103, %107 : vector<8x128xf32>
    %109 = arith.index_cast %79 : i32 to index
    %c0_30 = arith.constant 0 : index
    %110 = vector.load %arg8[%109, %c0_30] : memref<64x128xf32, #tpu.memory_space<vmem>>, vector<8x128xf32>
    tpu.vector_store %arg8[%109, %c0_30], %108 {strides = array<i32>} : memref<64x128xf32, #tpu.memory_space<vmem>>, vector<8x128xf32>,
    %111 = arith.truncf %108 : vector<8x128xf32> to vector<8x128xbf16>
    %c3_i32 = arith.constant 3 : i32
    %c8_i32_31 = arith.constant 8 : i32
    %112 = arith.muli %c3_i32, %c8_i32_31 : i32
    %113 = tpu.assume_multiple %112, 8 : i32
    %114 = arith.index_cast %113 : i32 to index
    %c0_32 = arith.constant 0 : index
    %115 = vector.load %arg7[%114, %c0_32] : memref<64x512xf32, #tpu.memory_space<vmem>>, vector<8x512xf32>
    %cst_33 = arith.constant dense<0.000000e+00> : vector<8x512xf32>
    %116 = tpu.matmul %111, %7, %cst_33 {dimension_numbers = #tpu.dot_dimension_numbers<[1], [0], [0], [1], [0, 0, 1, 1], [], []>} : vector<8x128xbf16>, vector<128x512xbf16>, vector<8x512xf32> -> vector<8x512xf32>
    %117 = arith.addf %115, %116 : vector<8x512xf32>
    %118 = vector.extract_strided_slice %117 {offsets = [0, 0], sizes = [8, 128], strides = [1, 1]} : vector<8x512xf32> to vector<8x128xf32>
    %119 = arith.negf %118 : vector<8x128xf32>
    %120 = math.exp %119 : vector<8x128xf32>
    %cst_34 = arith.constant 1.000000e+00 : f32
    %121 = vector.broadcast %cst_34 : f32 to vector<8x128xf32>
    %122 = arith.addf %121, %120 : vector<8x128xf32>
    %123 = arith.divf %121, %122 : vector<8x128xf32>
    %124 = vector.extract_strided_slice %117 {offsets = [0, 128], sizes = [8, 128], strides = [1, 1]} : vector<8x512xf32> to vector<8x128xf32>
    %125 = arith.negf %124 : vector<8x128xf32>
    %126 = math.exp %125 : vector<8x128xf32>
    %cst_35 = arith.constant 1.000000e+00 : f32
    %127 = vector.broadcast %cst_35 : f32 to vector<8x128xf32>
    %128 = arith.addf %127, %126 : vector<8x128xf32>
    %129 = arith.divf %127, %128 : vector<8x128xf32>
    %130 = vector.extract_strided_slice %117 {offsets = [0, 256], sizes = [8, 128], strides = [1, 1]} : vector<8x512xf32> to vector<8x128xf32>
    %131 = math.tanh %130 : vector<8x128xf32>
    %132 = vector.extract_strided_slice %117 {offsets = [0, 384], sizes = [8, 128], strides = [1, 1]} : vector<8x512xf32> to vector<8x128xf32>
    %133 = arith.negf %132 : vector<8x128xf32>
    %134 = math.exp %133 : vector<8x128xf32>
    %cst_36 = arith.constant 1.000000e+00 : f32
    %135 = vector.broadcast %cst_36 : f32 to vector<8x128xf32>
    %136 = arith.addf %135, %134 : vector<8x128xf32>
    %137 = arith.divf %135, %136 : vector<8x128xf32>
    %138 = arith.mulf %129, %106 : vector<8x128xf32>
    %139 = arith.mulf %123, %131 : vector<8x128xf32>
    %140 = arith.addf %138, %139 : vector<8x128xf32>
    %141 = math.tanh %140 : vector<8x128xf32>
    %142 = arith.mulf %137, %141 : vector<8x128xf32>
    %143 = arith.index_cast %113 : i32 to index
    %c0_37 = arith.constant 0 : index
    %144 = vector.load %arg8[%143, %c0_37] : memref<64x128xf32, #tpu.memory_space<vmem>>, vector<8x128xf32>
    tpu.vector_store %arg8[%143, %c0_37], %142 {strides = array<i32>} : memref<64x128xf32, #tpu.memory_space<vmem>>, vector<8x128xf32>,
    %145 = arith.truncf %142 : vector<8x128xf32> to vector<8x128xbf16>
    %c4_i32 = arith.constant 4 : i32
    %c8_i32_38 = arith.constant 8 : i32
    %146 = arith.muli %c4_i32, %c8_i32_38 : i32
    %147 = tpu.assume_multiple %146, 8 : i32
    %148 = arith.index_cast %147 : i32 to index
    %c0_39 = arith.constant 0 : index
    %149 = vector.load %arg7[%148, %c0_39] : memref<64x512xf32, #tpu.memory_space<vmem>>, vector<8x512xf32>
    %cst_40 = arith.constant dense<0.000000e+00> : vector<8x512xf32>
    %150 = tpu.matmul %145, %7, %cst_40 {dimension_numbers = #tpu.dot_dimension_numbers<[1], [0], [0], [1], [0, 0, 1, 1], [], []>} : vector<8x128xbf16>, vector<128x512xbf16>, vector<8x512xf32> -> vector<8x512xf32>
    %151 = arith.addf %149, %150 : vector<8x512xf32>
    %152 = vector.extract_strided_slice %151 {offsets = [0, 0], sizes = [8, 128], strides = [1, 1]} : vector<8x512xf32> to vector<8x128xf32>
    %153 = arith.negf %152 : vector<8x128xf32>
    %154 = math.exp %153 : vector<8x128xf32>
    %cst_41 = arith.constant 1.000000e+00 : f32
    %155 = vector.broadcast %cst_41 : f32 to vector<8x128xf32>
    %156 = arith.addf %155, %154 : vector<8x128xf32>
    %157 = arith.divf %155, %156 : vector<8x128xf32>
    %158 = vector.extract_strided_slice %151 {offsets = [0, 128], sizes = [8, 128], strides = [1, 1]} : vector<8x512xf32> to vector<8x128xf32>
    %159 = arith.negf %158 : vector<8x128xf32>
    %160 = math.exp %159 : vector<8x128xf32>
    %cst_42 = arith.constant 1.000000e+00 : f32
    %161 = vector.broadcast %cst_42 : f32 to vector<8x128xf32>
    %162 = arith.addf %161, %160 : vector<8x128xf32>
    %163 = arith.divf %161, %162 : vector<8x128xf32>
    %164 = vector.extract_strided_slice %151 {offsets = [0, 256], sizes = [8, 128], strides = [1, 1]} : vector<8x512xf32> to vector<8x128xf32>
    %165 = math.tanh %164 : vector<8x128xf32>
    %166 = vector.extract_strided_slice %151 {offsets = [0, 384], sizes = [8, 128], strides = [1, 1]} : vector<8x512xf32> to vector<8x128xf32>
    %167 = arith.negf %166 : vector<8x128xf32>
    %168 = math.exp %167 : vector<8x128xf32>
    %cst_43 = arith.constant 1.000000e+00 : f32
    %169 = vector.broadcast %cst_43 : f32 to vector<8x128xf32>
    %170 = arith.addf %169, %168 : vector<8x128xf32>
    %171 = arith.divf %169, %170 : vector<8x128xf32>
    %172 = arith.mulf %163, %140 : vector<8x128xf32>
    %173 = arith.mulf %157, %165 : vector<8x128xf32>
    %174 = arith.addf %172, %173 : vector<8x128xf32>
    %175 = math.tanh %174 : vector<8x128xf32>
    %176 = arith.mulf %171, %175 : vector<8x128xf32>
    %177 = arith.index_cast %147 : i32 to index
    %c0_44 = arith.constant 0 : index
    %178 = vector.load %arg8[%177, %c0_44] : memref<64x128xf32, #tpu.memory_space<vmem>>, vector<8x128xf32>
    tpu.vector_store %arg8[%177, %c0_44], %176 {strides = array<i32>} : memref<64x128xf32, #tpu.memory_space<vmem>>, vector<8x128xf32>,
    %179 = arith.truncf %176 : vector<8x128xf32> to vector<8x128xbf16>
    %c5_i32 = arith.constant 5 : i32
    %c8_i32_45 = arith.constant 8 : i32
    %180 = arith.muli %c5_i32, %c8_i32_45 : i32
    %181 = tpu.assume_multiple %180, 8 : i32
    %182 = arith.index_cast %181 : i32 to index
    %c0_46 = arith.constant 0 : index
    %183 = vector.load %arg7[%182, %c0_46] : memref<64x512xf32, #tpu.memory_space<vmem>>, vector<8x512xf32>
    %cst_47 = arith.constant dense<0.000000e+00> : vector<8x512xf32>
    %184 = tpu.matmul %179, %7, %cst_47 {dimension_numbers = #tpu.dot_dimension_numbers<[1], [0], [0], [1], [0, 0, 1, 1], [], []>} : vector<8x128xbf16>, vector<128x512xbf16>, vector<8x512xf32> -> vector<8x512xf32>
    %185 = arith.addf %183, %184 : vector<8x512xf32>
    %186 = vector.extract_strided_slice %185 {offsets = [0, 0], sizes = [8, 128], strides = [1, 1]} : vector<8x512xf32> to vector<8x128xf32>
    %187 = arith.negf %186 : vector<8x128xf32>
    %188 = math.exp %187 : vector<8x128xf32>
    %cst_48 = arith.constant 1.000000e+00 : f32
    %189 = vector.broadcast %cst_48 : f32 to vector<8x128xf32>
    %190 = arith.addf %189, %188 : vector<8x128xf32>
    %191 = arith.divf %189, %190 : vector<8x128xf32>
    %192 = vector.extract_strided_slice %185 {offsets = [0, 128], sizes = [8, 128], strides = [1, 1]} : vector<8x512xf32> to vector<8x128xf32>
    %193 = arith.negf %192 : vector<8x128xf32>
    %194 = math.exp %193 : vector<8x128xf32>
    %cst_49 = arith.constant 1.000000e+00 : f32
    %195 = vector.broadcast %cst_49 : f32 to vector<8x128xf32>
    %196 = arith.addf %195, %194 : vector<8x128xf32>
    %197 = arith.divf %195, %196 : vector<8x128xf32>
    %198 = vector.extract_strided_slice %185 {offsets = [0, 256], sizes = [8, 128], strides = [1, 1]} : vector<8x512xf32> to vector<8x128xf32>
    %199 = math.tanh %198 : vector<8x128xf32>
    %200 = vector.extract_strided_slice %185 {offsets = [0, 384], sizes = [8, 128], strides = [1, 1]} : vector<8x512xf32> to vector<8x128xf32>
    %201 = arith.negf %200 : vector<8x128xf32>
    %202 = math.exp %201 : vector<8x128xf32>
    %cst_50 = arith.constant 1.000000e+00 : f32
    %203 = vector.broadcast %cst_50 : f32 to vector<8x128xf32>
    %204 = arith.addf %203, %202 : vector<8x128xf32>
    %205 = arith.divf %203, %204 : vector<8x128xf32>
    %206 = arith.mulf %197, %174 : vector<8x128xf32>
    %207 = arith.mulf %191, %199 : vector<8x128xf32>
    %208 = arith.addf %206, %207 : vector<8x128xf32>
    %209 = math.tanh %208 : vector<8x128xf32>
    %210 = arith.mulf %205, %209 : vector<8x128xf32>
    %211 = arith.index_cast %181 : i32 to index
    %c0_51 = arith.constant 0 : index
    %212 = vector.load %arg8[%211, %c0_51] : memref<64x128xf32, #tpu.memory_space<vmem>>, vector<8x128xf32>
    tpu.vector_store %arg8[%211, %c0_51], %210 {strides = array<i32>} : memref<64x128xf32, #tpu.memory_space<vmem>>, vector<8x128xf32>,
    %213 = arith.truncf %210 : vector<8x128xf32> to vector<8x128xbf16>
    %c6_i32 = arith.constant 6 : i32
    %c8_i32_52 = arith.constant 8 : i32
    %214 = arith.muli %c6_i32, %c8_i32_52 : i32
    %215 = tpu.assume_multiple %214, 8 : i32
    %216 = arith.index_cast %215 : i32 to index
    %c0_53 = arith.constant 0 : index
    %217 = vector.load %arg7[%216, %c0_53] : memref<64x512xf32, #tpu.memory_space<vmem>>, vector<8x512xf32>
    %cst_54 = arith.constant dense<0.000000e+00> : vector<8x512xf32>
    %218 = tpu.matmul %213, %7, %cst_54 {dimension_numbers = #tpu.dot_dimension_numbers<[1], [0], [0], [1], [0, 0, 1, 1], [], []>} : vector<8x128xbf16>, vector<128x512xbf16>, vector<8x512xf32> -> vector<8x512xf32>
    %219 = arith.addf %217, %218 : vector<8x512xf32>
    %220 = vector.extract_strided_slice %219 {offsets = [0, 0], sizes = [8, 128], strides = [1, 1]} : vector<8x512xf32> to vector<8x128xf32>
    %221 = arith.negf %220 : vector<8x128xf32>
    %222 = math.exp %221 : vector<8x128xf32>
    %cst_55 = arith.constant 1.000000e+00 : f32
    %223 = vector.broadcast %cst_55 : f32 to vector<8x128xf32>
    %224 = arith.addf %223, %222 : vector<8x128xf32>
    %225 = arith.divf %223, %224 : vector<8x128xf32>
    %226 = vector.extract_strided_slice %219 {offsets = [0, 128], sizes = [8, 128], strides = [1, 1]} : vector<8x512xf32> to vector<8x128xf32>
    %227 = arith.negf %226 : vector<8x128xf32>
    %228 = math.exp %227 : vector<8x128xf32>
    %cst_56 = arith.constant 1.000000e+00 : f32
    %229 = vector.broadcast %cst_56 : f32 to vector<8x128xf32>
    %230 = arith.addf %229, %228 : vector<8x128xf32>
    %231 = arith.divf %229, %230 : vector<8x128xf32>
    %232 = vector.extract_strided_slice %219 {offsets = [0, 256], sizes = [8, 128], strides = [1, 1]} : vector<8x512xf32> to vector<8x128xf32>
    %233 = math.tanh %232 : vector<8x128xf32>
    %234 = vector.extract_strided_slice %219 {offsets = [0, 384], sizes = [8, 128], strides = [1, 1]} : vector<8x512xf32> to vector<8x128xf32>
    %235 = arith.negf %234 : vector<8x128xf32>
    %236 = math.exp %235 : vector<8x128xf32>
    %cst_57 = arith.constant 1.000000e+00 : f32
    %237 = vector.broadcast %cst_57 : f32 to vector<8x128xf32>
    %238 = arith.addf %237, %236 : vector<8x128xf32>
    %239 = arith.divf %237, %238 : vector<8x128xf32>
    %240 = arith.mulf %231, %208 : vector<8x128xf32>
    %241 = arith.mulf %225, %233 : vector<8x128xf32>
    %242 = arith.addf %240, %241 : vector<8x128xf32>
    %243 = math.tanh %242 : vector<8x128xf32>
    %244 = arith.mulf %239, %243 : vector<8x128xf32>
    %245 = arith.index_cast %215 : i32 to index
    %c0_58 = arith.constant 0 : index
    %246 = vector.load %arg8[%245, %c0_58] : memref<64x128xf32, #tpu.memory_space<vmem>>, vector<8x128xf32>
    tpu.vector_store %arg8[%245, %c0_58], %244 {strides = array<i32>} : memref<64x128xf32, #tpu.memory_space<vmem>>, vector<8x128xf32>,
    %247 = arith.truncf %244 : vector<8x128xf32> to vector<8x128xbf16>
    %c7_i32 = arith.constant 7 : i32
    %c8_i32_59 = arith.constant 8 : i32
    %248 = arith.muli %c7_i32, %c8_i32_59 : i32
    %249 = tpu.assume_multiple %248, 8 : i32
    %250 = arith.index_cast %249 : i32 to index
    %c0_60 = arith.constant 0 : index
    %251 = vector.load %arg7[%250, %c0_60] : memref<64x512xf32, #tpu.memory_space<vmem>>, vector<8x512xf32>
    %cst_61 = arith.constant dense<0.000000e+00> : vector<8x512xf32>
    %252 = tpu.matmul %247, %7, %cst_61 {dimension_numbers = #tpu.dot_dimension_numbers<[1], [0], [0], [1], [0, 0, 1, 1], [], []>} : vector<8x128xbf16>, vector<128x512xbf16>, vector<8x512xf32> -> vector<8x512xf32>
    %253 = arith.addf %251, %252 : vector<8x512xf32>
    %254 = vector.extract_strided_slice %253 {offsets = [0, 0], sizes = [8, 128], strides = [1, 1]} : vector<8x512xf32> to vector<8x128xf32>
    %255 = arith.negf %254 : vector<8x128xf32>
    %256 = math.exp %255 : vector<8x128xf32>
    %cst_62 = arith.constant 1.000000e+00 : f32
    %257 = vector.broadcast %cst_62 : f32 to vector<8x128xf32>
    %258 = arith.addf %257, %256 : vector<8x128xf32>
    %259 = arith.divf %257, %258 : vector<8x128xf32>
    %260 = vector.extract_strided_slice %253 {offsets = [0, 128], sizes = [8, 128], strides = [1, 1]} : vector<8x512xf32> to vector<8x128xf32>
    %261 = arith.negf %260 : vector<8x128xf32>
    %262 = math.exp %261 : vector<8x128xf32>
    %cst_63 = arith.constant 1.000000e+00 : f32
    %263 = vector.broadcast %cst_63 : f32 to vector<8x128xf32>
    %264 = arith.addf %263, %262 : vector<8x128xf32>
    %265 = arith.divf %263, %264 : vector<8x128xf32>
    %266 = vector.extract_strided_slice %253 {offsets = [0, 256], sizes = [8, 128], strides = [1, 1]} : vector<8x512xf32> to vector<8x128xf32>
    %267 = math.tanh %266 : vector<8x128xf32>
    %268 = vector.extract_strided_slice %253 {offsets = [0, 384], sizes = [8, 128], strides = [1, 1]} : vector<8x512xf32> to vector<8x128xf32>
    %269 = arith.negf %268 : vector<8x128xf32>
    %270 = math.exp %269 : vector<8x128xf32>
    %cst_64 = arith.constant 1.000000e+00 : f32
    %271 = vector.broadcast %cst_64 : f32 to vector<8x128xf32>
    %272 = arith.addf %271, %270 : vector<8x128xf32>
    %273 = arith.divf %271, %272 : vector<8x128xf32>
    %274 = arith.mulf %265, %242 : vector<8x128xf32>
    %275 = arith.mulf %259, %267 : vector<8x128xf32>
    %276 = arith.addf %274, %275 : vector<8x128xf32>
    %277 = math.tanh %276 : vector<8x128xf32>
    %278 = arith.mulf %273, %277 : vector<8x128xf32>
    %279 = arith.index_cast %249 : i32 to index
    %c0_65 = arith.constant 0 : index
    %280 = vector.load %arg8[%279, %c0_65] : memref<64x128xf32, #tpu.memory_space<vmem>>, vector<8x128xf32>
    tpu.vector_store %arg8[%279, %c0_65], %278 {strides = array<i32>} : memref<64x128xf32, #tpu.memory_space<vmem>>, vector<8x128xf32>,
    %281 = arith.truncf %278 : vector<8x128xf32> to vector<8x128xbf16>
    %c8_i32_66 = arith.constant 8 : i32
    %c0_67 = arith.constant 0 : index
    %c0_68 = arith.constant 0 : index
    %282 = vector.load %arg8[%c0_67, %c0_68] : memref<64x128xf32, #tpu.memory_space<vmem>>, vector<64x128xf32>
    %283 = arith.truncf %282 : vector<64x128xf32> to vector<64x128xbf16>
    %c0_69 = arith.constant 0 : index
    %c0_70 = arith.constant 0 : index
    %284 = vector.load %arg4[%c0_69, %c0_70] : memref<128x128xbf16, #tpu.memory_space<vmem>>, vector<128x128xbf16>
    %cst_71 = arith.constant dense<0.000000e+00> : vector<64x128xf32>
    %285 = tpu.matmul %283, %284, %cst_71 {dimension_numbers = #tpu.dot_dimension_numbers<[1], [0], [0], [1], [0, 0, 1, 1], [], []>} : vector<64x128xbf16>, vector<128x128xbf16>, vector<64x128xf32> -> vector<64x128xf32>
    %c0_72 = arith.constant 0 : index
    %c0_73 = arith.constant 0 : index
    %286 = vector.load %arg5[%c0_72, %c0_73] : memref<1x128xf32, #tpu.memory_space<vmem>>, vector<1x128xf32>
    %287 = vector.broadcast %286 : vector<1x128xf32> to vector<64x128xf32>
    %288 = arith.addf %285, %287 : vector<64x128xf32>
    %cst_74 = arith.constant dense<0xFF800000> : vector<64xf32>
    %289 = vector.multi_reduction <maximumf>, %288, %cst_74 [1] : vector<64x128xf32> to vector<64xf32>
    %290 = vector.shape_cast %289 : vector<64xf32> to vector<64x1xf32>
    %291 = vector.broadcast %290 : vector<64x1xf32> to vector<64x128xf32>
    %292 = arith.subf %288, %291 : vector<64x128xf32>
    %293 = math.exp %292 : vector<64x128xf32>
    %cst_75 = arith.constant dense<0.000000e+00> : vector<64xf32>
    %294 = vector.multi_reduction <add>, %293, %cst_75 [1] : vector<64x128xf32> to vector<64xf32>
    %295 = vector.shape_cast %294 : vector<64xf32> to vector<64x1xf32>
    %296 = math.log %295 : vector<64x1xf32>
    %297 = arith.addf %296, %290 : vector<64x1xf32>
    %298 = vector.broadcast %297 : vector<64x1xf32> to vector<64x128xf32>
    %299 = arith.subf %288, %298 : vector<64x128xf32>
    %c0_76 = arith.constant 0 : index
    %c0_77 = arith.constant 0 : index
    %300 = vector.load %arg6[%c0_76, %c0_77] : memref<64x128xf32, #tpu.memory_space<vmem>>, vector<64x128xf32>
    tpu.vector_store %arg6[%c0_76, %c0_77], %299 {strides = array<i32>} : memref<64x128xf32, #tpu.memory_space<vmem>>, vector<64x128xf32>,
    return
  }
}

</mosaic_0001>

<bundles_post_ra>
// kernel: tpu_custom_call.1
= control target key start
LH: loop header
LB: loop body
LE: loop exit
PB: predicated region body
PF: predicated region fallthrough
CT: control target
= control target key end

     0   :  { %11 = vsyncpa [#allocation5], 0  ;;  %s2917_s0 = inlined_call_operand.vmem [shape: bf16[64,32], index: 0, kind: input, shape index: {}]   ;;  %s2918_s1 = inlined_call_operand.hbm [shape: bf16[32,512], index: 1, kind: input, shape index: {}]   ;;  %s2919_s2 = inlined_call_operand.hbm [shape: bf16[128,512], index: 2, kind: input, shape index: {}]   ;;  %s2920_s3 = inlined_call_operand.vmem [shape: f32[1,512], index: 3, kind: input, shape index: {}]   ;;  %s2921_s4 = inlined_call_operand.hbm [shape: bf16[128,128], index: 4, kind: input, shape index: {}]   ;;  %s2922_s5 = inlined_call_operand.vmem [shape: f32[1,128], index: 5, kind: input, shape index: {}]   ;;  %s2923_s6 = inlined_call_operand.hbm [shape: f32[64,128], index: 6, kind: output, shape index: {}]  }
   0x1   :  { %12 = vsyncpa [#allocation8], 0 }
   0x2   :  { %13 = vsyncpa [#allocation6], 0  ;;  %s2256_s21 = smov [#allocation7]   ;;  %s2257_s23 = smov [#allocation4]  }
   0x3   :  { %s33_s22 = sshll.u32 %s2256_s21, 4  ;;  %s21_s24 = sshll.u32 %s2257_s23, 4  ;;  %s34_s22 = int_to_ptr.vmem [resolvable:$true] %s33_s22  ;;  %s22_s24 = int_to_ptr.vmem [resolvable:$true] %s21_s24 }
   0x4   :  { %s2178_s25 = scalar_lea.vmem %s34_s22, 4096  ;;  %p2183_p1 = scmp.lt.s32.totalorder %s34_s22, %s34_s22 }
   0x5   :  { %p2179_p0 = scmp.ne.s32.totalorder %s34_s22, %s2178_s25  ;;  %p2184_p2 = scmp.lt.s32.totalorder %s2178_s25, %s2178_s25 }
   0x7   :  { %p2185_p3 = por %p2184_p2, %p2183_p1 }
   0x9   :  { %p2186_p4 = pnand %p2185_p3, %p2179_p0 }
   0xb   :  { %2189 = shalt.err (!%p2186_p4)
}
   0xc   :  { %s2258_s26 = smov 256   ;;  %s2259_s27 = smov 16  }
   0xd   :  { %39 = dma.hbm_to_vmem [thread:$0]  %s2919_s2, 4096, %s34_s22, [#allocation8], %s2258_s26, %s2258_s26, %s2259_s27  }
   0xe   :  { %s2198_s30 = scalar_lea.vmem %s22_s24, 1024  ;;  %p2203_p6 = scmp.lt.s32.totalorder %s22_s24, %s22_s24 }
   0xf   :  { %p2199_p5 = scmp.ne.s32.totalorder %s22_s24, %s2198_s30  ;;  %p2204_p7 = scmp.lt.s32.totalorder %s2198_s30, %s2198_s30 }
  0x11   :  { %p2205_p8 = por %p2204_p7, %p2203_p6 }
  0x13   :  { %p2206_p9 = pnand %p2205_p8, %p2199_p5 }
  0x15   :  { %2209 = shalt.err (!%p2206_p9)
}
  0x16   :  { %27 = dma.hbm_to_vmem [thread:$0]  %s2918_s1, 1024, %s22_s24, [#allocation5], %s2258_s26, %s2258_s26, %s2259_s27  }
  0x17   :  { %s2260_s9 = smov [#allocation9]  }
  0x18   :  { %s47_s10 = sshll.u32 %s2260_s9, 4  ;;  %s48_s10 = int_to_ptr.vmem [resolvable:$true] %s47_s10 }
  0x19   :  { %s2218_s11 = scalar_lea.vmem %s48_s10, 1024  ;;  %p2223_p11 = scmp.lt.s32.totalorder %s48_s10, %s48_s10 }
  0x1a   :  { %p2219_p10 = scmp.ne.s32.totalorder %s48_s10, %s2218_s11  ;;  %p2224_p12 = scmp.lt.s32.totalorder %s2218_s11, %s2218_s11 }
  0x1c   :  { %p2225_p13 = por %p2224_p12, %p2223_p11 }
  0x1e   :  { %p2226_p0 = pnand %p2225_p13, %p2219_p10 }
  0x20   :  { %2229 = shalt.err (!%p2226_p0)
}
  0x21   :  { %s2261_s2 = smov 64   ;;  %s2262_s12 = smov 4  }
  0x22   :  { %53 = dma.hbm_to_vmem [thread:$0]  %s2921_s4, 1024, %s48_s10, [#allocation8], %s2261_s2, %s2261_s2, %s2262_s12  }
  0x23   :  { %2250 = dma.done.wait [#allocation5], 1024  }
  0x24   :  { %2251 = vsyncadd [#allocation5], 4294966272 }
  0x25   :  { %2252 = dma.done.wait [#allocation8], 5120  }
  0x26   :  { %2253 = vsyncadd [#allocation8], 4294962176  ;;  %v2924_v0 = vmov 0   ;;  %v1906_v1 = vld [vmem:[#allocation4 + $0x24] ss:$16 sps:$4 sm:$0xff]   ;;  %vm164_vm0 = vcmask 261120   ;;  %v84_v45 = vlaneseq }
  0x27   :  { %209 = vmatprep.mubr.bf16.mxu1 %v2924_v0  ;;  %586 = vmatprep.mubr.bf16.mxu0 %v2924_v0  ;;  %v2313_v2 = vld [vmem:[#allocation7 + $0xe4] ss:$16 sps:$4 sm:$0xff]   ;;  %v1910_v3 = vld [vmem:[#allocation4 + $0x20] ss:$16 sps:$4 sm:$0xff]   ;;  %v1919_v10 = vld [vmem:[#allocation4 + $0x28] ss:$16 sps:$4 sm:$0xff]  }
  0x28   :  { %189 = vmatprep.subr.bf16.mxu1 %v1906_v1  ;;  %v2315_v4 = vld [vmem:[#allocation7 + $0xe0] ss:$16 sps:$4 sm:$0xff]   ;;  %554 = vmatprep.subr.bf16.mxu0 %v2313_v2  ;;  %v1912_v5 = vld [vmem:[#allocation4 + $0x4] ss:$16 sps:$4 sm:$0xff]   ;;  %v1921_v11 = vld [vmem:[#allocation4 + $0x2c] ss:$16 sps:$4 sm:$0xff]  }
  0x29   :  { %190 = vmatpush1.bf16.msra.mxu1 %v1910_v3  ;;  %555 = vmatpush1.bf16.msra.mxu0 %v2315_v4  ;;  %v2319_v6 = vld [vmem:[#allocation7 + $0xc4] ss:$16 sps:$4 sm:$0xff]   ;;  %v1916_v7 = vld [vmem:[#allocation4] ss:$16 sps:$4 sm:$0xff]   ;;  %v1928_v17 = vld [vmem:[%s2917_s0 + $0x8] sm:$0xff]   ;;  %v85_v46 = vshrl.u32 %v84_v45, 7 }
  0x2a   :  { %191 = vmatprep.subr.bf16.mxu1 %v1912_v5  ;;  %v2321_v8 = vld [vmem:[#allocation7 + $0xc0] ss:$16 sps:$4 sm:$0xff]   ;;  %556 = vmatprep.subr.bf16.mxu0 %v2319_v6  ;;  %v2328_v12 = vld [vmem:[#allocation7 + $0xa4] ss:$16 sps:$4 sm:$0xff]   ;;  %v1938_v19 = vld [vmem:[#allocation4 + $0xc] ss:$16 sps:$4 sm:$0xff]  }
  0x2b   :  { %v1918_v9 = vld [vmem:[%s2917_s0] sm:$0xff]   ;;  %v1936_v21 = vld [vmem:[#allocation4 + $0x8] ss:$16 sps:$4 sm:$0xff]   ;;  %v2357_v23 = vld [vmem:[#allocation7 + $0xec] ss:$16 sps:$4 sm:$0xff]   ;;  %v86_v47 = vsub.s32 0, %v85_v46 }
  0x2c   :  { %v2330_v13 = vld [vmem:[#allocation7 + $0xa0] ss:$16 sps:$4 sm:$0xff]   ;;  %v2332_v14 = vld [vmem:[#allocation7 + $0x84] ss:$16 sps:$4 sm:$0xff]   ;;  %v1945_v29 = vld [vmem:[%s2917_s0 + $0x18] sm:$0xff]   ;;  %v90_v50 = vsub.s32 1, %v85_v46 }
  0x2d   :  { %192 = vmatpush1.bf16.msra.mxu1 %v1916_v7  ;;  %557 = vmatpush1.bf16.msra.mxu0 %v2321_v8  ;;  %v2337_v15 = vld [vmem:[#allocation7 + $0x80] ss:$16 sps:$4 sm:$0xff]   ;;  %v2341_v16 = vld [vmem:[#allocation7 + $0x64] ss:$16 sps:$4 sm:$0xff]   ;;  %v2389_v30 = vld [vmem:[#allocation7 + $0xe8] ss:$16 sps:$4 sm:$0xff]  }
  0x2e   :  { %262 = vmatprep.subr.bf16.mxu1 %v1921_v11  ;;  %558 = vmatprep.subr.bf16.mxu0 %v2328_v12  ;;  %v2346_v18 = vld [vmem:[#allocation7 + $0x60] ss:$16 sps:$4 sm:$0xff]   ;;  %v2350_v20 = vld [vmem:[#allocation7 + $0x44] ss:$16 sps:$4 sm:$0xff]   ;;  %v2392_v31 = vld [vmem:[#allocation7 + $0xcc] ss:$16 sps:$4 sm:$0xff]  }
  0x2f   :  { %v2353_v22 = vld [vmem:[#allocation7 + $0x40] ss:$16 sps:$4 sm:$0xff]   ;;  %v2360_v24 = vld [vmem:[#allocation7 + $0x24] ss:$16 sps:$4 sm:$0xff]   ;;  %v2397_v32 = vld [vmem:[#allocation7 + $0xc8] ss:$16 sps:$4 sm:$0xff]  }
  0x30   :  { %1786 = vmatmul.mubr.msk.bf16.vlgmr.msra.gmra.mxu1 %vm164_vm0, %v1918_v9  ;;  %v1935_v25 = vld [vmem:[%s2917_s0 + $0x10] sm:$0xff]   ;;  %v2401_v33 = vld [vmem:[#allocation7 + $0xac] ss:$16 sps:$4 sm:$0xff]   ;;  %v2406_v34 = vld [vmem:[#allocation7 + $0xa8] ss:$16 sps:$4 sm:$0xff]  }
  0x31   :  { %263 = vmatpush1.bf16.msra.mxu1 %v1919_v10  ;;  %559 = vmatpush1.bf16.msra.mxu0 %v2330_v13  ;;  %v2367_v26 = vld [vmem:[#allocation7 + $0x20] ss:$16 sps:$4 sm:$0xff]   ;;  %v2370_v27 = vld [vmem:[#allocation7 + $0x4] ss:$16 sps:$4 sm:$0xff]   ;;  %v2409_v35 = vld [vmem:[#allocation7 + $0x8c] ss:$16 sps:$4 sm:$0xff]  }
  0x32   :  { %560 = vmatprep.subr.bf16.mxu0 %v2332_v14  ;;  %219 = vmatprep.mubr.bf16.mxu1 %v2924_v0  ;;  %v2374_v28 = vld [vmem:[#allocation7] ss:$16 sps:$4 sm:$0xff]   ;;  %v2415_v36 = vld [vmem:[#allocation7 + $0x88] ss:$16 sps:$4 sm:$0xff]   ;;  %v2419_v37 = vld [vmem:[#allocation7 + $0x6c] ss:$16 sps:$4 sm:$0xff]  }
  0x33   :  { %264 = vmatprep.subr.bf16.mxu1 %v1938_v19  ;;  %v2424_v38 = vld [vmem:[#allocation7 + $0x68] ss:$16 sps:$4 sm:$0xff]   ;;  %v2427_v39 = vld [vmem:[#allocation7 + $0x4c] ss:$16 sps:$4 sm:$0xff]   ;;  %v82_v48 = vld [vmem:[%s2920_s3] sm:$0xf] }
  0x34   :  { %v2433_v40 = vld [vmem:[#allocation7 + $0x48] ss:$16 sps:$4 sm:$0xff]   ;;  %v2437_v41 = vld [vmem:[#allocation7 + $0x2c] ss:$16 sps:$4 sm:$0xff]   ;;  %v87_v52 = vrot.slane %v82_v48, %v86_v47  ;;  %v91_v54 = vrot.slane %v82_v48, %v90_v50 }
  0x35   :  { %561 = vmatpush1.bf16.msra.mxu0 %v2337_v15  ;;  %265 = vmatpush1.bf16.msra.mxu1 %v1936_v21  ;;  %v2442_v42 = vld [vmem:[#allocation7 + $0x28] ss:$16 sps:$4 sm:$0xff]   ;;  %v2445_v43 = vld [vmem:[#allocation7 + $0xc] ss:$16 sps:$4 sm:$0xff]  }
  0x36   :  { %562 = vmatprep.subr.bf16.mxu0 %v2341_v16  ;;  %595 = vmatprep.subr.bf16.mxu1 %v2357_v23  ;;  %v2451_v44 = vld [vmem:[#allocation7 + $0x8] ss:$16 sps:$4 sm:$0xff]  }
  0x38   :  { %1787 = vmatmul.mubr.msk.bf16.gmra.mxu1 %vm164_vm0, %v1928_v17 }
  0x39   :  { %563 = vmatpush1.bf16.msra.mxu0 %v2346_v18  ;;  %229 = vmatprep.mubr.bf16.mxu1 %v2924_v0 }
  0x3a   :  { %564 = vmatprep.subr.bf16.mxu0 %v2350_v20 }
  0x3d   :  { %565 = vmatpush1.bf16.msra.mxu0 %v2353_v22 }
  0x3e   :  { %566 = vmatprep.subr.bf16.mxu0 %v2360_v24 }
  0x40   :  { %1788 = vmatmul.mubr.msk.bf16.gmra.mxu1 %vm164_vm0, %v1935_v25 }
  0x41   :  { %567 = vmatpush1.bf16.msra.mxu0 %v2367_v26  ;;  %239 = vmatprep.mubr.bf16.mxu1 %v2924_v0 }
  0x42   :  { %568 = vmatprep.subr.bf16.mxu0 %v2370_v27 }
  0x45   :  { %569 = vmatpush1.bf16.msra.mxu0 %v2374_v28 }
  0x46   :  { %673 = vmatprep.subr.bf16.mxu0 %v2313_v2 }
  0x48   :  { %1789 = vmatmul.mubr.msk.bf16.gmra.mxu1 %vm164_vm0, %v1945_v29  ;;  %587 = vmatmul.mubr.bf16.vlgmr.msra.gmra.mxu0 %v2924_v0 }
  0x49   :  { %282 = vmatprep.mubr.bf16.mxu1 %v2924_v0  ;;  %674 = vmatpush1.bf16.msra.mxu0 %v2315_v4 }
  0x4a   :  { %675 = vmatprep.subr.bf16.mxu0 %v2319_v6  ;;  %705 = vmatprep.mubr.bf16.mxu0 %v2924_v0 }
  0x4d   :  { %676 = vmatpush1.bf16.msra.mxu0 %v2321_v8 }
  0x4e   :  { %677 = vmatprep.subr.bf16.mxu0 %v2328_v12 }
  0x50   :  { %1790 = vmatmul.mubr.msk.bf16.vlgmr.msra.gmra.mxu1 %vm164_vm0, %v1918_v9 }
  0x51   :  { %596 = vmatpush1.bf16.msra.mxu1 %v2389_v30  ;;  %292 = vmatprep.mubr.bf16.mxu1 %v2924_v0 }
  0x52   :  { %597 = vmatprep.subr.bf16.mxu1 %v2392_v31  ;;  %678 = vmatpush1.bf16.msra.mxu0 %v2330_v13 }
  0x53   :  { %679 = vmatprep.subr.bf16.mxu0 %v2332_v14 }
  0x55   :  { %598 = vmatpush1.bf16.msra.mxu1 %v2397_v32 }
  0x56   :  { %599 = vmatprep.subr.bf16.mxu1 %v2401_v33  ;;  %680 = vmatpush1.bf16.msra.mxu0 %v2337_v15 }
  0x57   :  { %681 = vmatprep.subr.bf16.mxu0 %v2341_v16 }
  0x58   :  { %1791 = vmatmul.mubr.msk.bf16.gmra.mxu1 %vm164_vm0, %v1928_v17 }
  0x59   :  { %600 = vmatpush1.bf16.msra.mxu1 %v2406_v34  ;;  %302 = vmatprep.mubr.bf16.mxu1 %v2924_v0 }
  0x5a   :  { %601 = vmatprep.subr.bf16.mxu1 %v2409_v35  ;;  %682 = vmatpush1.bf16.msra.mxu0 %v2346_v18 }
  0x5b   :  { %683 = vmatprep.subr.bf16.mxu0 %v2350_v20 }
  0x5d   :  { %602 = vmatpush1.bf16.msra.mxu1 %v2415_v36 }
  0x5e   :  { %603 = vmatprep.subr.bf16.mxu1 %v2419_v37  ;;  %684 = vmatpush1.bf16.msra.mxu0 %v2353_v22 }
  0x5f   :  { %685 = vmatprep.subr.bf16.mxu0 %v2360_v24 }
  0x60   :  { %1792 = vmatmul.mubr.msk.bf16.gmra.mxu1 %vm164_vm0, %v1935_v25 }
  0x61   :  { %604 = vmatpush1.bf16.msra.mxu1 %v2424_v38  ;;  %312 = vmatprep.mubr.bf16.mxu1 %v2924_v0 }
  0x62   :  { %605 = vmatprep.subr.bf16.mxu1 %v2427_v39  ;;  %686 = vmatpush1.bf16.msra.mxu0 %v2367_v26 }
  0x63   :  { %687 = vmatprep.subr.bf16.mxu0 %v2370_v27 }
  0x65   :  { %606 = vmatpush1.bf16.msra.mxu1 %v2433_v40 }
  0x66   :  { %607 = vmatprep.subr.bf16.mxu1 %v2437_v41  ;;  %688 = vmatpush1.bf16.msra.mxu0 %v2374_v28 }
  0x67   :  { %793 = vmatprep.subr.bf16.mxu0 %v2313_v2 }
  0x68   :  { %1793 = vmatmul.mubr.msk.bf16.gmra.mxu1 %vm164_vm0, %v1945_v29 }
  0x69   :  { %608 = vmatpush1.bf16.msra.mxu1 %v2442_v42  ;;  %627 = vmatprep.mubr.bf16.mxu1 %v2924_v0 }
  0x6a   :  { %609 = vmatprep.subr.bf16.mxu1 %v2445_v43 }
  0x6d   :  { %610 = vmatpush1.bf16.msra.mxu1 %v2451_v44 }
  0x6e   :  { %714 = vmatprep.subr.bf16.mxu1 %v2357_v23 }
  0x70   :  { %628 = vmatmul.mubr.bf16.vlgmr.msra.gmra.mxu1 %v2924_v0 }
  0x71   :  { %715 = vmatpush1.bf16.msra.mxu1 %v2389_v30  ;;  %746 = vmatprep.mubr.bf16.mxu1 %v2924_v0 }
  0x72   :  { %716 = vmatprep.subr.bf16.mxu1 %v2392_v31 }
  0x75   :  { %717 = vmatpush1.bf16.msra.mxu1 %v2397_v32 }
  0x76   :  { %718 = vmatprep.subr.bf16.mxu1 %v2401_v33 }
  0x79   :  { %719 = vmatpush1.bf16.msra.mxu1 %v2406_v34 }
  0x7a   :  { %720 = vmatprep.subr.bf16.mxu1 %v2409_v35 }
  0x7d   :  { %721 = vmatpush1.bf16.msra.mxu1 %v2415_v36 }
  0x7e   :  { %722 = vmatprep.subr.bf16.mxu1 %v2419_v37 }
  0x81   :  { %723 = vmatpush1.bf16.msra.mxu1 %v2424_v38 }
  0x82   :  { %724 = vmatprep.subr.bf16.mxu1 %v2427_v39 }
  0x85   :  { %725 = vmatpush1.bf16.msra.mxu1 %v2433_v40 }
  0x86   :  { %726 = vmatprep.subr.bf16.mxu1 %v2437_v41 }
  0x89   :  { %727 = vmatpush1.bf16.msra.mxu1 %v2442_v42 }
  0x8a   :  { %728 = vmatprep.subr.bf16.mxu1 %v2445_v43 }
  0x8d   :  { %729 = vmatpush1.bf16.msra.mxu1 %v2451_v44 }
  0x8e   :  { %834 = vmatprep.subr.bf16.mxu1 %v2357_v23 }
  0xf0   :  { %v211_v49 = vpop.f32.mrf.mxu1 }
  0xf2   :  { %v213_v51 = vpop.f32.mrf.mxu1 }
  0xf4   :  { %v215_v53 = vpop.f32.mrf.mxu1 }
  0xf5   :  { %v2478_v55 = vadd.f32 %v215_v53, %v87_v52 }
  0xf6   :  { %v217_v56 = vpop.f32.mrf.mxu1 }
  0xf7   :  { %v2480_v57 = vadd.f32 %v217_v56, %v91_v54 }
  0xf8   :  { %v221_v58 = vpop.f32.mrf.mxu1 }
  0xf9   :  { %v2482_v59 = vadd.f32 %v221_v58, %v87_v52 }
  0xfa   :  { %v223_v60 = vpop.f32.mrf.mxu1 }
  0xfb   :  { %v2484_v61 = vadd.f32 %v223_v60, %v91_v54 }
  0xfc   :  { %v225_v62 = vpop.f32.mrf.mxu1 }
  0xfd   :  { %v2486_v63 = vadd.f32 %v225_v62, %v87_v52 }
  0xfe   :  { %v227_v1 = vpop.f32.mrf.mxu1 }
  0xff   :  { %v2488_v3 = vadd.f32 %v227_v1, %v91_v54 }
 0x100   :  { %v231_v5 = vpop.f32.mrf.mxu1 }
 0x101   :  { %2926 = vst [vmem:[#allocation14_spill] sm:$0xff] %v2488_v3  ;;  %v2490_v7 = vadd.f32 %v231_v5, %v87_v52 }
 0x102   :  { %v233_v9 = vpop.f32.mrf.mxu1 }
 0x103   :  { %2927 = vst [vmem:[#allocation15_spill] sm:$0xff] %v2490_v7  ;;  %v2492_v10 = vadd.f32 %v233_v9, %v91_v54  ;;  %v94_v9 = vsub.s32 2, %v85_v46 }
 0x104   :  { %v235_v11 = vpop.f32.mrf.mxu1 }
 0x105   :  { %2928 = vst [vmem:[#allocation16_spill] sm:$0xff] %v2492_v10  ;;  %v2494_v17 = vadd.f32 %v235_v11, %v87_v52 }
 0x106   :  { %v237_v19 = vpop.f32.mrf.mxu1 }
 0x107   :  { %2929 = vst [vmem:[#allocation17_spill] sm:$0xff] %v2494_v17  ;;  %v2496_v21 = vadd.f32 %v237_v19, %v91_v54  ;;  %v98_v19 = vsub.s32 3, %v85_v46  ;;  %v95_v17 = vrot.slane %v82_v48, %v94_v9 }
 0x108   :  { %v241_v25 = vpop.f32.mrf.mxu1  ;;  %v588_v29 = vpop.f32.mrf.mxu0 }
 0x109   :  { %2930 = vst [vmem:[#allocation18_spill] sm:$0xff] %v2496_v21  ;;  %v2498_v45 = vadd.f32 %v241_v25, %v87_v52  ;;  %v214_v21 = vadd.f32 %v213_v51, %v91_v54  ;;  %v212_v25 = vadd.f32 %v211_v49, %v87_v52  ;;  %v99_v7 = vrot.slane %v82_v48, %v98_v19 }
 0x10a   :  { %v243_v47 = vpop.f32.mrf.mxu1  ;;  %v590_v50 = vpop.f32.mrf.mxu0 }
 0x10b   :  { %2931 = vst [vmem:[#allocation19_spill] sm:$0xff] %v2498_v45  ;;  %v2500_v53 = vadd.f32 %v243_v47, %v91_v54  ;;  %v637_v10 = vadd.f32 %v590_v50, %v214_v21 }
 0x10c   :  { %v245_v56 = vpop.f32.mrf.mxu1  ;;  %v592_v58 = vpop.f32.mrf.mxu0 }
 0x10d   :  { %2932 = vst [vmem:[#allocation20_spill] sm:$0xff] %v2500_v53  ;;  %v2502_v60 = vadd.f32 %v245_v56, %v87_v52  ;;  %v636_v53 = vadd.f32 %v588_v29, %v212_v25 }
 0x10e   :  { %v247_v62 = vpop.f32.mrf.mxu1  ;;  %v593_v1 = vpop.f32.mrf.mxu0 }
 0x10f   :  { %2933 = vst [vmem:[#allocation21_spill] sm:$0xff] %v2502_v60  ;;  %v2504_v5 = vadd.f32 %v247_v62, %v91_v54  ;;  %v1827_v1 = vmul.f32 -1.442695, %v637_v10 }
 0x110   :  { %v284_v11 = vpop.f32.mrf.mxu1 }
 0x111   :  { %2934 = vst [vmem:[#allocation22_spill] sm:$0xff] %v2504_v5  ;;  %v1826_v5 = vmul.f32 -1.442695, %v636_v53  ;;  %1978 = vpow2.f32 %v1827_v1 }
 0x112   :  { %v286_v0 = vpop.f32.mrf.mxu1 }
 0x113   :  { %1980 = vpow2.f32 %v1826_v5 }
 0x114   :  { %v288_v45 = vpop.f32.mrf.mxu1 }
 0x115   :  { %v2506_v47 = vadd.f32 %v288_v45, %v95_v17 }
 0x116   :  { %v290_v58 = vpop.f32.mrf.mxu1 }
 0x117   :  { %v2508_v56 = vadd.f32 %v290_v58, %v99_v7 }
 0x118   :  { %v294_v60 = vpop.f32.mrf.mxu1 }
 0x119   :  { %v2510_v62 = vadd.f32 %v294_v60, %v95_v17 }
 0x11a   :  { %v296_v3 = vpop.f32.mrf.mxu1 }
 0x11b   :  { %v2512_v46 = vadd.f32 %v296_v3, %v99_v7 }
 0x11c   :  { %v298_v51 = vpop.f32.mrf.mxu1 }
 0x11d   :  { %v2514_v49 = vadd.f32 %v298_v51, %v95_v17 }
 0x11e   :  { %v300_v48 = vpop.f32.mrf.mxu1  ;;  %v1979_v19 = vpop.eup %1978 }
 0x11f   :  { %2935 = vst [vmem:[#allocation23_spill] sm:$0xff] %v2514_v49  ;;  %v2516_v52 = vadd.f32 %v300_v48, %v99_v7  ;;  %v649_v51 = vadd.f32 1.0, %v1979_v19 }
 0x120   :  { %v304_v54 = vpop.f32.mrf.mxu1  ;;  %v1981_v25 = vpop.eup %1980 }
 0x121   :  { %v2518_v21 = vadd.f32 %v304_v54, %v95_v17  ;;  %v643_v54 = vadd.f32 1.0, %v1981_v25  ;;  %1982 = vrcp.f32 %v649_v51 }
 0x122   :  { %v306_v29 = vpop.f32.mrf.mxu1 }
 0x123   :  { %2936 = vst [vmem:[#allocation24_spill] sm:$0xff] %v2518_v21  ;;  %v2520_v45 = vadd.f32 %v306_v29, %v99_v7  ;;  %v285_v21 = vadd.f32 %v284_v11, %v95_v17  ;;  %1984 = vrcp.f32 %v643_v54 }
 0x124   :  { %v308_v10 = vpop.f32.mrf.mxu1 }
 0x125   :  { %2937 = vst [vmem:[#allocation25_spill] sm:$0xff] %v2520_v45  ;;  %v2522_v50 = vadd.f32 %v308_v10, %v95_v17 }
 0x126   :  { %v310_v53 = vpop.f32.mrf.mxu1 }
 0x127   :  { %2938 = vst [vmem:[#allocation26_spill] sm:$0xff] %v2522_v50  ;;  %v2524_v3 = vadd.f32 %v310_v53, %v99_v7  ;;  %v287_v53 = vadd.f32 %v286_v0, %v99_v7 }
 0x128   :  { %v314_v60 = vpop.f32.mrf.mxu1 }
 0x129   :  { %2939 = vst [vmem:[#allocation27_spill] sm:$0xff] %v2524_v3  ;;  %v2526_v9 = vadd.f32 %v314_v60, %v95_v17 }
 0x12a   :  { %v316_v5 = vpop.f32.mrf.mxu1 }
 0x12b   :  { %2940 = vst [vmem:[#allocation28_spill] sm:$0xff] %v2526_v9  ;;  %v2528_v58 = vadd.f32 %v316_v5, %v99_v7 }
 0x12c   :  { %v318_v1 = vpop.f32.mrf.mxu1 }
 0x12d   :  { %2941 = vst [vmem:[#allocation29_spill] sm:$0xff] %v2528_v58  ;;  %v2530_v48 = vadd.f32 %v318_v1, %v95_v17 }
 0x12e   :  { %v320_v29 = vpop.f32.mrf.mxu1  ;;  %v1983_v19 = vpop.eup %1982 }
 0x12f   :  { %2942 = vst [vmem:[#allocation30_spill] sm:$0xff] %v2530_v48  ;;  %v2532_v10 = vadd.f32 %v320_v29, %v99_v7  ;;  %v659_v25 = vmul.f32 0.0, %v1983_v19 }
 0x130   :  { %v629_v50 = vpop.f32.mrf.mxu1  ;;  %v1985_v1 = vpop.eup %1984 }
 0x131   :  { %v638_v3 = vadd.f32 %v629_v50, %v285_v21 }
 0x132   :  { %v631_v60 = vpop.f32.mrf.mxu1 }
 0x133   :  { %1986 = vtanh.f32 %v638_v3  ;;  %v639_v9 = vadd.f32 %v631_v60, %v287_v53 }
 0x134   :  { %v633_v45 = vpop.f32.mrf.mxu1 }
 0x135   :  { %v1828_v5 = vmul.f32 -1.442695, %v639_v9 }
 0x136   :  { %v634_v58 = vpop.f32.mrf.mxu1 }
 0x137   :  { %1988 = vpow2.f32 %v1828_v5 }
 0x140   :  { %v1987_v48 = vpop.eup %1986 }
 0x141   :  { %v660_v49 = vmul.f32 %v1987_v48, %v1985_v1 }
 0x143   :  { %v2534_v17 = vadd.f32 %v660_v49, %v659_v25  ;;  %v2943_v49 = vmov 0  }
 0x144   :  { %v1989_v11 = vpop.eup %1988 }
 0x145   :  { %v656_v29 = vadd.f32 1.0, %v1989_v11  ;;  %1990 = vtanh.f32 %v2534_v17 }
 0x147   :  { %1992 = vrcp.f32 %v656_v29 }
 0x152   :  { %v1991_v0 = vpop.eup %1990 }
 0x154   :  { %v1993_v7 = vpop.eup %1992 }
 0x155   :  { %v2537_v21 = vmul.f32 %v1993_v7, %v1991_v0 }
 0x157   :  { %v665_v45 = vpack.c.bf16 %v2537_v21, %v2537_v21 }
 0x159   :  { %706 = vmatmul.mubr.bf16.vlgmr.msra.gmra.mxu0 %v665_v45  ;;  %747 = vmatmul.mubr.bf16.vlgmr.msra.gmra.mxu1 %v665_v45 }
 0x15a   :  { %794 = vmatpush1.bf16.msra.mxu0 %v2315_v4  ;;  %835 = vmatpush1.bf16.msra.mxu1 %v2389_v30 }
 0x15b   :  { %795 = vmatprep.subr.bf16.mxu0 %v2319_v6  ;;  %836 = vmatprep.subr.bf16.mxu1 %v2392_v31 }
 0x15c   :  { %825 = vmatprep.mubr.bf16.mxu0 %v2943_v49  ;;  %866 = vmatprep.mubr.bf16.mxu1 %v2943_v49 }
 0x15e   :  { %796 = vmatpush1.bf16.msra.mxu0 %v2321_v8  ;;  %837 = vmatpush1.bf16.msra.mxu1 %v2397_v32 }
 0x15f   :  { %797 = vmatprep.subr.bf16.mxu0 %v2328_v12  ;;  %838 = vmatprep.subr.bf16.mxu1 %v2401_v33 }
 0x162   :  { %798 = vmatpush1.bf16.msra.mxu0 %v2330_v13  ;;  %839 = vmatpush1.bf16.msra.mxu1 %v2406_v34 }
 0x163   :  { %799 = vmatprep.subr.bf16.mxu0 %v2332_v14  ;;  %840 = vmatprep.subr.bf16.mxu1 %v2409_v35 }
 0x166   :  { %800 = vmatpush1.bf16.msra.mxu0 %v2337_v15  ;;  %841 = vmatpush1.bf16.msra.mxu1 %v2415_v36 }
 0x167   :  { %801 = vmatprep.subr.bf16.mxu0 %v2341_v16  ;;  %842 = vmatprep.subr.bf16.mxu1 %v2419_v37 }
 0x16a   :  { %802 = vmatpush1.bf16.msra.mxu0 %v2346_v18  ;;  %843 = vmatpush1.bf16.msra.mxu1 %v2424_v38 }
 0x16b   :  { %803 = vmatprep.subr.bf16.mxu0 %v2350_v20  ;;  %844 = vmatprep.subr.bf16.mxu1 %v2427_v39 }
 0x16e   :  { %804 = vmatpush1.bf16.msra.mxu0 %v2353_v22  ;;  %845 = vmatpush1.bf16.msra.mxu1 %v2433_v40 }
 0x16f   :  { %805 = vmatprep.subr.bf16.mxu0 %v2360_v24  ;;  %846 = vmatprep.subr.bf16.mxu1 %v2437_v41 }
 0x172   :  { %806 = vmatpush1.bf16.msra.mxu0 %v2367_v26  ;;  %847 = vmatpush1.bf16.msra.mxu1 %v2442_v42 }
 0x173   :  { %807 = vmatprep.subr.bf16.mxu0 %v2370_v27  ;;  %848 = vmatprep.subr.bf16.mxu1 %v2445_v43 }
 0x176   :  { %808 = vmatpush1.bf16.msra.mxu0 %v2374_v28  ;;  %849 = vmatpush1.bf16.msra.mxu1 %v2451_v44 }
 0x177   :  { %913 = vmatprep.subr.bf16.mxu0 %v2313_v2  ;;  %954 = vmatprep.subr.bf16.mxu1 %v2357_v23 }
 0x219   :  { %v707_v50 = vpop.f32.mrf.mxu0  ;;  %v748_v3 = vpop.f32.mrf.mxu1 }
 0x21a   :  { %v755_v9 = vadd.f32 %v707_v50, %v2478_v55  ;;  %v757_v11 = vadd.f32 %v748_v3, %v2506_v47 }
 0x21b   :  { %v709_v58 = vpop.f32.mrf.mxu0  ;;  %v750_v51 = vpop.f32.mrf.mxu1 }
 0x21c   :  { %v1829_v48 = vmul.f32 -1.442695, %v755_v9  ;;  %v756_v54 = vadd.f32 %v709_v58, %v2480_v57  ;;  %v758_v25 = vadd.f32 %v750_v51, %v2508_v56 }
 0x21d   :  { %v711_v53 = vpop.f32.mrf.mxu0  ;;  %v752_v60 = vpop.f32.mrf.mxu1 }
 0x21e   :  { %1994 = vpow2.f32 %v1829_v48  ;;  %v1830_v5 = vmul.f32 -1.442695, %v756_v54  ;;  %v1831_v29 = vmul.f32 -1.442695, %v758_v25 }
 0x21f   :  { %v712_v19 = vpop.f32.mrf.mxu0  ;;  %v753_v1 = vpop.f32.mrf.mxu1 }
 0x220   :  { %1996 = vpow2.f32 %v1830_v5 }
 0x221   :  { %1998 = vtanh.f32 %v757_v11 }
 0x222   :  { %2000 = vpow2.f32 %v1831_v29 }
 0x22b   :  { %v1995_v0 = vpop.eup %1994 }
 0x22c   :  { %v762_v7 = vadd.f32 1.0, %v1995_v0 }
 0x22d   :  { %v1997_v55 = vpop.eup %1996 }
 0x22e   :  { %2002 = vrcp.f32 %v762_v7  ;;  %v768_v45 = vadd.f32 1.0, %v1997_v55  ;;  %v1999_v57 = vpop.eup %1998 }
 0x22f   :  { %v2001_v50 = vpop.eup %2000 }
 0x230   :  { %2004 = vrcp.f32 %v768_v45  ;;  %v775_v54 = vadd.f32 1.0, %v2001_v50 }
 0x232   :  { %2006 = vrcp.f32 %v775_v54 }
 0x23b   :  { %v2003_v9 = vpop.eup %2002 }
 0x23c   :  { %v779_v58 = vmul.f32 %v2003_v9, %v1999_v57 }
 0x23d   :  { %v2005_v48 = vpop.eup %2004 }
 0x23e   :  { %v778_v53 = vmul.f32 %v2005_v48, %v2534_v17 }
 0x23f   :  { %v2007_v47 = vpop.eup %2006 }
 0x240   :  { %v2580_v56 = vadd.f32 %v779_v58, %v778_v53 }
 0x242   :  { %2008 = vtanh.f32 %v2580_v56 }
 0x24f   :  { %v2009_v3 = vpop.eup %2008 }
 0x250   :  { %v2583_v51 = vmul.f32 %v2009_v3, %v2007_v47 }
 0x252   :  { %v785_v60 = vpack.c.bf16 %v2583_v51, %v2583_v51 }
 0x254   :  { %826 = vmatmul.mubr.bf16.vlgmr.msra.gmra.mxu0 %v785_v60  ;;  %867 = vmatmul.mubr.bf16.vlgmr.msra.gmra.mxu1 %v785_v60 }
 0x255   :  { %914 = vmatpush1.bf16.msra.mxu0 %v2315_v4  ;;  %955 = vmatpush1.bf16.msra.mxu1 %v2389_v30 }
 0x256   :  { %915 = vmatprep.subr.bf16.mxu0 %v2319_v6  ;;  %956 = vmatprep.subr.bf16.mxu1 %v2392_v31 }
 0x257   :  { %945 = vmatprep.mubr.bf16.mxu0 %v2943_v49  ;;  %986 = vmatprep.mubr.bf16.mxu1 %v2943_v49 }
 0x259   :  { %916 = vmatpush1.bf16.msra.mxu0 %v2321_v8  ;;  %957 = vmatpush1.bf16.msra.mxu1 %v2397_v32 }
 0x25a   :  { %917 = vmatprep.subr.bf16.mxu0 %v2328_v12  ;;  %958 = vmatprep.subr.bf16.mxu1 %v2401_v33 }
 0x25d   :  { %918 = vmatpush1.bf16.msra.mxu0 %v2330_v13  ;;  %959 = vmatpush1.bf16.msra.mxu1 %v2406_v34 }
 0x25e   :  { %919 = vmatprep.subr.bf16.mxu0 %v2332_v14  ;;  %960 = vmatprep.subr.bf16.mxu1 %v2409_v35 }
 0x261   :  { %920 = vmatpush1.bf16.msra.mxu0 %v2337_v15  ;;  %961 = vmatpush1.bf16.msra.mxu1 %v2415_v36 }
 0x262   :  { %921 = vmatprep.subr.bf16.mxu0 %v2341_v16  ;;  %962 = vmatprep.subr.bf16.mxu1 %v2419_v37 }
 0x265   :  { %922 = vmatpush1.bf16.msra.mxu0 %v2346_v18  ;;  %963 = vmatpush1.bf16.msra.mxu1 %v2424_v38 }
 0x266   :  { %923 = vmatprep.subr.bf16.mxu0 %v2350_v20  ;;  %964 = vmatprep.subr.bf16.mxu1 %v2427_v39 }
 0x269   :  { %924 = vmatpush1.bf16.msra.mxu0 %v2353_v22  ;;  %965 = vmatpush1.bf16.msra.mxu1 %v2433_v40 }
 0x26a   :  { %925 = vmatprep.subr.bf16.mxu0 %v2360_v24  ;;  %966 = vmatprep.subr.bf16.mxu1 %v2437_v41 }
 0x26d   :  { %926 = vmatpush1.bf16.msra.mxu0 %v2367_v26  ;;  %967 = vmatpush1.bf16.msra.mxu1 %v2442_v42 }
 0x26e   :  { %927 = vmatprep.subr.bf16.mxu0 %v2370_v27  ;;  %968 = vmatprep.subr.bf16.mxu1 %v2445_v43 }
 0x271   :  { %928 = vmatpush1.bf16.msra.mxu0 %v2374_v28  ;;  %969 = vmatpush1.bf16.msra.mxu1 %v2451_v44 }
 0x272   :  { %1033 = vmatprep.subr.bf16.mxu0 %v2313_v2  ;;  %1074 = vmatprep.subr.bf16.mxu1 %v2357_v23 }
 0x314   :  { %v827_v17 = vpop.f32.mrf.mxu0  ;;  %v868_v5 = vpop.f32.mrf.mxu1 }
 0x315   :  { %v875_v19 = vadd.f32 %v827_v17, %v2482_v59  ;;  %v877_v9 = vadd.f32 %v868_v5, %v2510_v62 }
 0x316   :  { %v829_v1 = vpop.f32.mrf.mxu0  ;;  %v870_v25 = vpop.f32.mrf.mxu1 }
 0x317   :  { %v1832_v11 = vmul.f32 -1.442695, %v875_v19  ;;  %v876_v29 = vadd.f32 %v829_v1, %v2484_v61  ;;  %v878_v50 = vadd.f32 %v870_v25, %v2512_v46 }
 0x318   :  { %v831_v0 = vpop.f32.mrf.mxu0  ;;  %v872_v7 = vpop.f32.mrf.mxu1 }
 0x319   :  { %2010 = vpow2.f32 %v1832_v11  ;;  %v1833_v55 = vmul.f32 -1.442695, %v876_v29  ;;  %v1834_v58 = vmul.f32 -1.442695, %v878_v50  ;;  %v2945_v50 = vld [vmem:[#allocation23_spill] sm:$0xff] }
 0x31a   :  { %v832_v45 = vpop.f32.mrf.mxu0  ;;  %v873_v57 = vpop.f32.mrf.mxu1 }
 0x31b   :  { %2012 = vpow2.f32 %v1833_v55 }
 0x31c   :  { %2014 = vtanh.f32 %v877_v9 }
 0x31d   :  { %2016 = vpow2.f32 %v1834_v58 }
 0x326   :  { %v2011_v48 = vpop.eup %2010 }
 0x327   :  { %v882_v54 = vadd.f32 1.0, %v2011_v48 }
 0x328   :  { %v2013_v59 = vpop.eup %2012 }
 0x329   :  { %2018 = vrcp.f32 %v882_v54  ;;  %v888_v53 = vadd.f32 1.0, %v2013_v59  ;;  %v2015_v61 = vpop.eup %2014 }
 0x32a   :  { %v2017_v47 = vpop.eup %2016 }
 0x32b   :  { %2020 = vrcp.f32 %v888_v53  ;;  %v895_v19 = vadd.f32 1.0, %v2017_v47 }
 0x32d   :  { %2022 = vrcp.f32 %v895_v19 }
 0x336   :  { %v2019_v3 = vpop.eup %2018 }
 0x337   :  { %v899_v60 = vmul.f32 %v2019_v3, %v2015_v61 }
 0x338   :  { %v2021_v17 = vpop.eup %2020 }
 0x339   :  { %v898_v1 = vmul.f32 %v2021_v17, %v2580_v56  ;;  %v2944_v56 = vld [vmem:[#allocation14_spill] sm:$0xff] }
 0x33a   :  { %v2023_v62 = vpop.eup %2022 }
 0x33b   :  { %v2626_v46 = vadd.f32 %v899_v60, %v898_v1 }
 0x33d   :  { %2024 = vtanh.f32 %v2626_v46 }
 0x34a   :  { %v2025_v5 = vpop.eup %2024 }
 0x34b   :  { %v2629_v25 = vmul.f32 %v2025_v5, %v2023_v62 }
 0x34d   :  { %v905_v11 = vpack.c.bf16 %v2629_v25, %v2629_v25 }
 0x34f   :  { %946 = vmatmul.mubr.bf16.vlgmr.msra.gmra.mxu0 %v905_v11  ;;  %987 = vmatmul.mubr.bf16.vlgmr.msra.gmra.mxu1 %v905_v11 }
 0x350   :  { %1034 = vmatpush1.bf16.msra.mxu0 %v2315_v4  ;;  %1075 = vmatpush1.bf16.msra.mxu1 %v2389_v30 }
 0x351   :  { %1035 = vmatprep.subr.bf16.mxu0 %v2319_v6  ;;  %1076 = vmatprep.subr.bf16.mxu1 %v2392_v31 }
 0x352   :  { %1065 = vmatprep.mubr.bf16.mxu0 %v2943_v49  ;;  %1106 = vmatprep.mubr.bf16.mxu1 %v2943_v49 }
 0x354   :  { %1036 = vmatpush1.bf16.msra.mxu0 %v2321_v8  ;;  %1077 = vmatpush1.bf16.msra.mxu1 %v2397_v32 }
 0x355   :  { %1037 = vmatprep.subr.bf16.mxu0 %v2328_v12  ;;  %1078 = vmatprep.subr.bf16.mxu1 %v2401_v33 }
 0x358   :  { %1038 = vmatpush1.bf16.msra.mxu0 %v2330_v13  ;;  %1079 = vmatpush1.bf16.msra.mxu1 %v2406_v34 }
 0x359   :  { %1039 = vmatprep.subr.bf16.mxu0 %v2332_v14  ;;  %1080 = vmatprep.subr.bf16.mxu1 %v2409_v35 }
 0x35c   :  { %1040 = vmatpush1.bf16.msra.mxu0 %v2337_v15  ;;  %1081 = vmatpush1.bf16.msra.mxu1 %v2415_v36 }
 0x35d   :  { %1041 = vmatprep.subr.bf16.mxu0 %v2341_v16  ;;  %1082 = vmatprep.subr.bf16.mxu1 %v2419_v37 }
 0x360   :  { %1042 = vmatpush1.bf16.msra.mxu0 %v2346_v18  ;;  %1083 = vmatpush1.bf16.msra.mxu1 %v2424_v38 }
 0x361   :  { %1043 = vmatprep.subr.bf16.mxu0 %v2350_v20  ;;  %1084 = vmatprep.subr.bf16.mxu1 %v2427_v39 }
 0x364   :  { %1044 = vmatpush1.bf16.msra.mxu0 %v2353_v22  ;;  %1085 = vmatpush1.bf16.msra.mxu1 %v2433_v40 }
 0x365   :  { %1045 = vmatprep.subr.bf16.mxu0 %v2360_v24  ;;  %1086 = vmatprep.subr.bf16.mxu1 %v2437_v41 }
 0x368   :  { %1046 = vmatpush1.bf16.msra.mxu0 %v2367_v26  ;;  %1087 = vmatpush1.bf16.msra.mxu1 %v2442_v42 }
 0x369   :  { %1047 = vmatprep.subr.bf16.mxu0 %v2370_v27  ;;  %1088 = vmatprep.subr.bf16.mxu1 %v2445_v43 }
 0x36c   :  { %1048 = vmatpush1.bf16.msra.mxu0 %v2374_v28  ;;  %1089 = vmatpush1.bf16.msra.mxu1 %v2451_v44 }
 0x36d   :  { %1153 = vmatprep.subr.bf16.mxu0 %v2313_v2  ;;  %1194 = vmatprep.subr.bf16.mxu1 %v2357_v23 }
 0x40f   :  { %v947_v4 = vpop.f32.mrf.mxu0  ;;  %v988_v6 = vpop.f32.mrf.mxu1 }
 0x410   :  { %v995_v8 = vadd.f32 %v947_v4, %v2486_v63  ;;  %v997_v9 = vadd.f32 %v988_v6, %v2945_v50  ;;  %v2679_v4 = vld [vmem:[#allocation7 + $0xe0] ss:$16 sps:$4 sm:$0xff]  }
 0x411   :  { %v949_v12 = vpop.f32.mrf.mxu0  ;;  %v990_v13 = vpop.f32.mrf.mxu1  ;;  %v2689_v6 = vld [vmem:[#allocation7 + $0xc0] ss:$16 sps:$4 sm:$0xff]  }
 0x412   :  { %v1835_v14 = vmul.f32 -1.442695, %v995_v8  ;;  %v996_v29 = vadd.f32 %v949_v12, %v2944_v56  ;;  %v998_v2 = vadd.f32 %v990_v13, %v2516_v52  ;;  %v2693_v8 = vld [vmem:[#allocation7 + $0xa4] ss:$16 sps:$4 sm:$0xff]   ;;  %v2697_v12 = vld [vmem:[#allocation7 + $0xa0] ss:$16 sps:$4 sm:$0xff]  }
 0x413   :  { %v951_v0 = vpop.f32.mrf.mxu0  ;;  %v992_v7 = vpop.f32.mrf.mxu1  ;;  %v2701_v13 = vld [vmem:[#allocation7 + $0x84] ss:$16 sps:$4 sm:$0xff]  }
 0x414   :  { %2026 = vpow2.f32 %v1835_v14  ;;  %v1836_v55 = vmul.f32 -1.442695, %v996_v29  ;;  %v1837_v58 = vmul.f32 -1.442695, %v998_v2  ;;  %v2949_v2 = vld [vmem:[#allocation24_spill] sm:$0xff] }
 0x415   :  { %v952_v45 = vpop.f32.mrf.mxu0  ;;  %v993_v57 = vpop.f32.mrf.mxu1 }
 0x416   :  { %2028 = vpow2.f32 %v1836_v55  ;;  %v2948_v45 = vld [vmem:[#allocation25_spill] sm:$0xff] }
 0x417   :  { %2030 = vtanh.f32 %v997_v9 }
 0x418   :  { %2032 = vpow2.f32 %v1837_v58 }
 0x421   :  { %v2027_v48 = vpop.eup %2026 }
 0x422   :  { %v1002_v54 = vadd.f32 1.0, %v2027_v48 }
 0x423   :  { %v2029_v63 = vpop.eup %2028 }
 0x424   :  { %2034 = vrcp.f32 %v1002_v54  ;;  %v1008_v59 = vadd.f32 1.0, %v2029_v63  ;;  %v2031_v53 = vpop.eup %2030 }
 0x425   :  { %v2033_v61 = vpop.eup %2032 }
 0x426   :  { %2036 = vrcp.f32 %v1008_v59  ;;  %v1015_v17 = vadd.f32 1.0, %v2033_v61 }
 0x428   :  { %2038 = vrcp.f32 %v1015_v17 }
 0x431   :  { %v2035_v47 = vpop.eup %2034 }
 0x432   :  { %v1019_v3 = vmul.f32 %v2035_v47, %v2031_v53 }
 0x433   :  { %v2037_v60 = vpop.eup %2036 }
 0x434   :  { %v1018_v19 = vmul.f32 %v2037_v60, %v2626_v46  ;;  %v2683_v46 = vld [vmem:[#allocation7 + $0xc4] ss:$16 sps:$4 sm:$0xff]  }
 0x435   :  { %v2039_v1 = vpop.eup %2038 }
 0x436   :  { %v2672_v52 = vadd.f32 %v1019_v3, %v1018_v19 }
 0x438   :  { %2040 = vtanh.f32 %v2672_v52 }
 0x445   :  { %v2041_v62 = vpop.eup %2040 }
 0x446   :  { %v2675_v5 = vmul.f32 %v2041_v62, %v2039_v1 }
 0x448   :  { %v1025_v11 = vpack.c.bf16 %v2675_v5, %v2675_v5 }
 0x44a   :  { %1066 = vmatmul.mubr.bf16.vlgmr.msra.gmra.mxu0 %v1025_v11  ;;  %1107 = vmatmul.mubr.bf16.vlgmr.msra.gmra.mxu1 %v1025_v11 }
 0x44b   :  { %1154 = vmatpush1.bf16.msra.mxu0 %v2679_v4  ;;  %1195 = vmatpush1.bf16.msra.mxu1 %v2389_v30 }
 0x44c   :  { %1155 = vmatprep.subr.bf16.mxu0 %v2683_v46  ;;  %1196 = vmatprep.subr.bf16.mxu1 %v2392_v31 }
 0x44d   :  { %1185 = vmatprep.mubr.bf16.mxu0 %v2943_v49  ;;  %1226 = vmatprep.mubr.bf16.mxu1 %v2943_v49 }
 0x44f   :  { %1156 = vmatpush1.bf16.msra.mxu0 %v2689_v6  ;;  %1197 = vmatpush1.bf16.msra.mxu1 %v2397_v32 }
 0x450   :  { %1157 = vmatprep.subr.bf16.mxu0 %v2693_v8  ;;  %1198 = vmatprep.subr.bf16.mxu1 %v2401_v33 }
 0x453   :  { %1158 = vmatpush1.bf16.msra.mxu0 %v2697_v12  ;;  %1199 = vmatpush1.bf16.msra.mxu1 %v2406_v34 }
 0x454   :  { %1159 = vmatprep.subr.bf16.mxu0 %v2701_v13  ;;  %1200 = vmatprep.subr.bf16.mxu1 %v2409_v35 }
 0x457   :  { %1160 = vmatpush1.bf16.msra.mxu0 %v2337_v15  ;;  %1201 = vmatpush1.bf16.msra.mxu1 %v2415_v36  ;;  %v2723_v15 = vld [vmem:[#allocation7 + $0xe4] ss:$16 sps:$4 sm:$0xff]  }
 0x458   :  { %1161 = vmatprep.subr.bf16.mxu0 %v2341_v16  ;;  %1202 = vmatprep.subr.bf16.mxu1 %v2419_v37 }
 0x45b   :  { %1162 = vmatpush1.bf16.msra.mxu0 %v2346_v18  ;;  %1203 = vmatpush1.bf16.msra.mxu1 %v2424_v38 }
 0x45c   :  { %1163 = vmatprep.subr.bf16.mxu0 %v2350_v20  ;;  %1204 = vmatprep.subr.bf16.mxu1 %v2427_v39  ;;  %v2946_v20 = vld [vmem:[#allocation15_spill] sm:$0xff] }
 0x45f   :  { %1164 = vmatpush1.bf16.msra.mxu0 %v2353_v22  ;;  %1205 = vmatpush1.bf16.msra.mxu1 %v2433_v40 }
 0x460   :  { %1165 = vmatprep.subr.bf16.mxu0 %v2360_v24  ;;  %1206 = vmatprep.subr.bf16.mxu1 %v2437_v41 }
 0x463   :  { %1166 = vmatpush1.bf16.msra.mxu0 %v2367_v26  ;;  %1207 = vmatpush1.bf16.msra.mxu1 %v2442_v42 }
 0x464   :  { %1167 = vmatprep.subr.bf16.mxu0 %v2370_v27  ;;  %1208 = vmatprep.subr.bf16.mxu1 %v2445_v43  ;;  %v2947_v27 = vld [vmem:[#allocation16_spill] sm:$0xff] }
 0x467   :  { %1168 = vmatpush1.bf16.msra.mxu0 %v2374_v28  ;;  %1209 = vmatpush1.bf16.msra.mxu1 %v2451_v44 }
 0x468   :  { %1273 = vmatprep.subr.bf16.mxu0 %v2723_v15  ;;  %1314 = vmatprep.subr.bf16.mxu1 %v2357_v23 }
 0x50a   :  { %v1067_v16 = vpop.f32.mrf.mxu0  ;;  %v1108_v18 = vpop.f32.mrf.mxu1 }
 0x50b   :  { %v1115_v22 = vadd.f32 %v1067_v16, %v2946_v20  ;;  %v1117_v23 = vadd.f32 %v1108_v18, %v2949_v2 }
 0x50c   :  { %v1069_v24 = vpop.f32.mrf.mxu0  ;;  %v1110_v26 = vpop.f32.mrf.mxu1 }
 0x50d   :  { %v1838_v14 = vmul.f32 -1.442695, %v1115_v22  ;;  %v1116_v56 = vadd.f32 %v1069_v24, %v2947_v27  ;;  %v1118_v57 = vadd.f32 %v1110_v26, %v2948_v45  ;;  %v2951_v22 = vld [vmem:[#allocation18_spill] sm:$0xff] }
 0x50e   :  { %v1071_v29 = vpop.f32.mrf.mxu0  ;;  %v1112_v0 = vpop.f32.mrf.mxu1 }
 0x50f   :  { %2042 = vpow2.f32 %v1838_v14  ;;  %v1839_v28 = vmul.f32 -1.442695, %v1116_v56  ;;  %v1840_v50 = vmul.f32 -1.442695, %v1118_v57  ;;  %v2953_v29 = vld [vmem:[#allocation26_spill] sm:$0xff] }
 0x510   :  { %v1072_v7 = vpop.f32.mrf.mxu0  ;;  %v1113_v55 = vpop.f32.mrf.mxu1 }
 0x511   :  { %2044 = vpow2.f32 %v1839_v28 }
 0x512   :  { %2046 = vtanh.f32 %v1117_v23 }
 0x513   :  { %2048 = vpow2.f32 %v1840_v50 }
 0x51c   :  { %v2043_v9 = vpop.eup %2042 }
 0x51d   :  { %v1122_v58 = vadd.f32 1.0, %v2043_v9 }
 0x51e   :  { %v2045_v48 = vpop.eup %2044 }
 0x51f   :  { %2050 = vrcp.f32 %v1122_v58  ;;  %v1128_v54 = vadd.f32 1.0, %v2045_v48  ;;  %v2047_v63 = vpop.eup %2046 }
 0x520   :  { %v2049_v59 = vpop.eup %2048 }
 0x521   :  { %2052 = vrcp.f32 %v1128_v54  ;;  %v1135_v3 = vadd.f32 1.0, %v2049_v59 }
 0x523   :  { %2054 = vrcp.f32 %v1135_v3  ;;  %v2155_v3 = vld [vmem:[#allocation7 + $0xe8] ss:$16 sps:$4 sm:$0xff]  }
 0x52c   :  { %v2051_v53 = vpop.eup %2050 }
 0x52d   :  { %v1139_v61 = vmul.f32 %v2051_v53, %v2047_v63 }
 0x52e   :  { %v2053_v47 = vpop.eup %2052 }
 0x52f   :  { %v1138_v60 = vmul.f32 %v2053_v47, %v2672_v52  ;;  %v2950_v52 = vld [vmem:[#allocation17_spill] sm:$0xff] }
 0x530   :  { %v2055_v19 = vpop.eup %2054 }
 0x531   :  { %v2732_v17 = vadd.f32 %v1139_v61, %v1138_v60  ;;  %v2156_v60 = vld [vmem:[#allocation7 + $0xcc] ss:$16 sps:$4 sm:$0xff]  }
 0x533   :  { %2056 = vtanh.f32 %v2732_v17 }
 0x540   :  { %v2057_v1 = vpop.eup %2056 }
 0x541   :  { %v2735_v62 = vmul.f32 %v2057_v1, %v2055_v19  ;;  %v2158_v19 = vld [vmem:[#allocation7 + $0xac] ss:$16 sps:$4 sm:$0xff]   ;;  %v2161_v1 = vld [vmem:[#allocation7 + $0x88] ss:$16 sps:$4 sm:$0xff]  }
 0x543   :  { %v1145_v11 = vpack.c.bf16 %v2735_v62, %v2735_v62 }
 0x545   :  { %1186 = vmatmul.mubr.bf16.vlgmr.msra.gmra.mxu0 %v1145_v11  ;;  %1227 = vmatmul.mubr.bf16.vlgmr.msra.gmra.mxu1 %v1145_v11  ;;  %v2167_v11 = vld [vmem:[#allocation7 + $0x28] ss:$16 sps:$4 sm:$0xff]  }
 0x546   :  { %1274 = vmatpush1.bf16.msra.mxu0 %v2679_v4  ;;  %1315 = vmatpush1.bf16.msra.mxu1 %v2389_v30  ;;  %v2753_v30 = vld [vmem:[#allocation7 + $0x80] ss:$16 sps:$4 sm:$0xff]  }
 0x547   :  { %1275 = vmatprep.subr.bf16.mxu0 %v2683_v46  ;;  %1316 = vmatprep.subr.bf16.mxu1 %v2392_v31  ;;  %v2757_v31 = vld [vmem:[#allocation7 + $0x64] ss:$16 sps:$4 sm:$0xff]  }
 0x548   :  { %1305 = vmatprep.mubr.bf16.mxu0 %v2943_v49  ;;  %1346 = vmatprep.mubr.bf16.mxu1 %v2943_v49 }
 0x54a   :  { %1276 = vmatpush1.bf16.msra.mxu0 %v2689_v6  ;;  %1317 = vmatpush1.bf16.msra.mxu1 %v2397_v32  ;;  %v2761_v32 = vld [vmem:[#allocation7 + $0x60] ss:$16 sps:$4 sm:$0xff]  }
 0x54b   :  { %1277 = vmatprep.subr.bf16.mxu0 %v2693_v8  ;;  %1318 = vmatprep.subr.bf16.mxu1 %v2401_v33  ;;  %v2765_v33 = vld [vmem:[#allocation7 + $0x44] ss:$16 sps:$4 sm:$0xff]  }
 0x54e   :  { %1278 = vmatpush1.bf16.msra.mxu0 %v2697_v12  ;;  %1319 = vmatpush1.bf16.msra.mxu1 %v2406_v34  ;;  %v2769_v34 = vld [vmem:[#allocation7 + $0x40] ss:$16 sps:$4 sm:$0xff]  }
 0x54f   :  { %1279 = vmatprep.subr.bf16.mxu0 %v2701_v13  ;;  %1320 = vmatprep.subr.bf16.mxu1 %v2409_v35  ;;  %v2773_v35 = vld [vmem:[#allocation7 + $0x24] ss:$16 sps:$4 sm:$0xff]  }
 0x552   :  { %1280 = vmatpush1.bf16.msra.mxu0 %v2753_v30  ;;  %1321 = vmatpush1.bf16.msra.mxu1 %v2415_v36  ;;  %v2777_v36 = vld [vmem:[#allocation7 + $0x20] ss:$16 sps:$4 sm:$0xff]  }
 0x553   :  { %1281 = vmatprep.subr.bf16.mxu0 %v2757_v31  ;;  %1322 = vmatprep.subr.bf16.mxu1 %v2419_v37  ;;  %v2781_v37 = vld [vmem:[#allocation7 + $0x4] ss:$16 sps:$4 sm:$0xff]  }
 0x556   :  { %1282 = vmatpush1.bf16.msra.mxu0 %v2761_v32  ;;  %1323 = vmatpush1.bf16.msra.mxu1 %v2424_v38  ;;  %v2785_v38 = vld [vmem:[#allocation7] ss:$16 sps:$4 sm:$0xff]  }
 0x557   :  { %1283 = vmatprep.subr.bf16.mxu0 %v2765_v33  ;;  %1324 = vmatprep.subr.bf16.mxu1 %v2427_v39  ;;  %v2154_v39 = vld [vmem:[#allocation7 + $0xec] ss:$16 sps:$4 sm:$0xff]  }
 0x55a   :  { %1284 = vmatpush1.bf16.msra.mxu0 %v2769_v34  ;;  %1325 = vmatpush1.bf16.msra.mxu1 %v2433_v40 }
 0x55b   :  { %1285 = vmatprep.subr.bf16.mxu0 %v2773_v35  ;;  %1326 = vmatprep.subr.bf16.mxu1 %v2437_v41 }
 0x55e   :  { %1286 = vmatpush1.bf16.msra.mxu0 %v2777_v36  ;;  %1327 = vmatpush1.bf16.msra.mxu1 %v2442_v42 }
 0x55f   :  { %1287 = vmatprep.subr.bf16.mxu0 %v2781_v37  ;;  %1328 = vmatprep.subr.bf16.mxu1 %v2445_v43 }
 0x562   :  { %1288 = vmatpush1.bf16.msra.mxu0 %v2785_v38  ;;  %1329 = vmatpush1.bf16.msra.mxu1 %v2451_v44  ;;  %v2952_v44 = vld [vmem:[#allocation27_spill] sm:$0xff] }
 0x563   :  { %1393 = vmatprep.subr.bf16.mxu0 %v2723_v15  ;;  %1434 = vmatprep.subr.bf16.mxu1 %v2154_v39  ;;  %v2954_v39 = vld [vmem:[#allocation19_spill] sm:$0xff] }
 0x605   :  { %v1187_v40 = vpop.f32.mrf.mxu0  ;;  %v1228_v41 = vpop.f32.mrf.mxu1 }
 0x606   :  { %v1235_v42 = vadd.f32 %v1187_v40, %v2950_v52  ;;  %v1237_v0 = vadd.f32 %v1228_v41, %v2953_v29 }
 0x607   :  { %v1189_v16 = vpop.f32.mrf.mxu0  ;;  %v1230_v18 = vpop.f32.mrf.mxu1 }
 0x608   :  { %v1841_v20 = vmul.f32 -1.442695, %v1235_v42  ;;  %v1236_v24 = vadd.f32 %v1189_v16, %v2951_v22  ;;  %v1238_v15 = vadd.f32 %v1230_v18, %v2952_v44 }
 0x609   :  { %v1191_v43 = vpop.f32.mrf.mxu0  ;;  %v1232_v26 = vpop.f32.mrf.mxu1 }
 0x60a   :  { %2058 = vpow2.f32 %v1841_v20  ;;  %v1842_v14 = vmul.f32 -1.442695, %v1236_v24  ;;  %v1843_v28 = vmul.f32 -1.442695, %v1238_v15  ;;  %v2957_v43 = vld [vmem:[#allocation28_spill] sm:$0xff] }
 0x60b   :  { %v1192_v27 = vpop.f32.mrf.mxu0  ;;  %v1233_v56 = vpop.f32.mrf.mxu1 }
 0x60c   :  { %2060 = vpow2.f32 %v1842_v14 }
 0x60d   :  { %2062 = vtanh.f32 %v1237_v0 }
 0x60e   :  { %2064 = vpow2.f32 %v1843_v28 }
 0x617   :  { %v2059_v7 = vpop.eup %2058 }
 0x618   :  { %v1242_v55 = vadd.f32 1.0, %v2059_v7 }
 0x619   :  { %v2061_v45 = vpop.eup %2060 }
 0x61a   :  { %2066 = vrcp.f32 %v1242_v55  ;;  %v1248_v57 = vadd.f32 1.0, %v2061_v45  ;;  %v2063_v2 = vpop.eup %2062 }
 0x61b   :  { %v2065_v23 = vpop.eup %2064 }
 0x61c   :  { %2068 = vrcp.f32 %v1248_v57  ;;  %v1255_v48 = vadd.f32 1.0, %v2065_v23 }
 0x61e   :  { %2070 = vrcp.f32 %v1255_v48  ;;  %v1971_v48 = vld [vmem:[#allocation9 + $0x30] sm:$0xff]  }
 0x627   :  { %v2067_v50 = vpop.eup %2066 }
 0x628   :  { %v1259_v9 = vmul.f32 %v2067_v50, %v2063_v2 }
 0x629   :  { %v2069_v58 = vpop.eup %2068 }
 0x62a   :  { %v1258_v54 = vmul.f32 %v2069_v58, %v2732_v17  ;;  %v2157_v17 = vld [vmem:[#allocation7 + $0xc8] ss:$16 sps:$4 sm:$0xff]  }
 0x62b   :  { %v2071_v59 = vpop.eup %2070 }
 0x62c   :  { %v2795_v63 = vadd.f32 %v1259_v9, %v1258_v54  ;;  %v1513_v54 = vpack.c.bf16 %v2583_v51, %v2537_v21  ;;  %v1977_v21 = vld [vmem:[#allocation9] sm:$0xff]   ;;  %v1514_v51 = vpack.c.bf16 %v2675_v5, %v2629_v25 }
 0x62e   :  { %2072 = vtanh.f32 %v2795_v63 }
 0x63b   :  { %v2073_v53 = vpop.eup %2072 }
 0x63c   :  { %v2798_v61 = vmul.f32 %v2073_v53, %v2071_v59  ;;  %v1973_v59 = vld [vmem:[#allocation9 + $0x20] sm:$0xff]   ;;  %v1974_v53 = vld [vmem:[#allocation9 + $0x18] sm:$0xff]  }
 0x63e   :  { %v1265_v47 = vpack.c.bf16 %v2798_v61, %v2798_v61 }
 0x640   :  { %1306 = vmatmul.mubr.bf16.vlgmr.msra.gmra.mxu0 %v1265_v47  ;;  %1347 = vmatmul.mubr.bf16.vlgmr.msra.gmra.mxu1 %v1265_v47  ;;  %v1975_v47 = vld [vmem:[#allocation9 + $0x10] sm:$0xff]  }
 0x641   :  { %1394 = vmatpush1.bf16.msra.mxu0 %v2679_v4  ;;  %1435 = vmatpush1.bf16.msra.mxu1 %v2155_v3  ;;  %v2159_v4 = vld [vmem:[#allocation7 + $0xa8] ss:$16 sps:$4 sm:$0xff]  }
 0x642   :  { %1395 = vmatprep.subr.bf16.mxu0 %v2683_v46  ;;  %1436 = vmatprep.subr.bf16.mxu1 %v2156_v60  ;;  %v2160_v46 = vld [vmem:[#allocation7 + $0x8c] ss:$16 sps:$4 sm:$0xff]   ;;  %v1515_v60 = vpack.c.bf16 %v2798_v61, %v2735_v62  ;;  %v2960_v62 = vld [vmem:[#allocation30_spill] sm:$0xff] }
 0x643   :  { %1425 = vmatprep.mubr.bf16.mxu0 %v2943_v49  ;;  %1466 = vmatprep.mubr.bf16.mxu1 %v2943_v49  ;;  %v2162_v49 = vld [vmem:[#allocation7 + $0x6c] ss:$16 sps:$4 sm:$0xff]  }
 0x644   :  { %v1976_v3 = vld [vmem:[#allocation9 + $0x8] sm:$0xff]  }
 0x645   :  { %1396 = vmatpush1.bf16.msra.mxu0 %v2689_v6  ;;  %1437 = vmatpush1.bf16.msra.mxu1 %v2157_v17  ;;  %v2163_v6 = vld [vmem:[#allocation7 + $0x68] ss:$16 sps:$4 sm:$0xff]  }
 0x646   :  { %1397 = vmatprep.subr.bf16.mxu0 %v2693_v8  ;;  %1438 = vmatprep.subr.bf16.mxu1 %v2158_v19  ;;  %v2164_v8 = vld [vmem:[#allocation7 + $0x4c] ss:$16 sps:$4 sm:$0xff]  }
 0x649   :  { %1398 = vmatpush1.bf16.msra.mxu0 %v2697_v12  ;;  %1439 = vmatpush1.bf16.msra.mxu1 %v2159_v4  ;;  %v2165_v12 = vld [vmem:[#allocation7 + $0x48] ss:$16 sps:$4 sm:$0xff]  }
 0x64a   :  { %1399 = vmatprep.subr.bf16.mxu0 %v2701_v13  ;;  %1440 = vmatprep.subr.bf16.mxu1 %v2160_v46  ;;  %v2166_v13 = vld [vmem:[#allocation7 + $0x2c] ss:$16 sps:$4 sm:$0xff]  }
 0x64b   :  { %v2958_v4 = vld [vmem:[#allocation21_spill] sm:$0xff] }
 0x64d   :  { %1400 = vmatpush1.bf16.msra.mxu0 %v2753_v30  ;;  %1441 = vmatpush1.bf16.msra.mxu1 %v2161_v1  ;;  %v2168_v30 = vld [vmem:[#allocation7 + $0xc] ss:$16 sps:$4 sm:$0xff]  }
 0x64e   :  { %1401 = vmatprep.subr.bf16.mxu0 %v2757_v31  ;;  %1442 = vmatprep.subr.bf16.mxu1 %v2162_v49  ;;  %v2169_v31 = vld [vmem:[#allocation7 + $0x8] ss:$16 sps:$4 sm:$0xff]  }
 0x651   :  { %1402 = vmatpush1.bf16.msra.mxu0 %v2761_v32  ;;  %1443 = vmatpush1.bf16.msra.mxu1 %v2163_v6  ;;  %v1970_v32 = vld [vmem:[#allocation9 + $0x38] sm:$0xff]  }
 0x652   :  { %1403 = vmatprep.subr.bf16.mxu0 %v2765_v33  ;;  %1444 = vmatprep.subr.bf16.mxu1 %v2164_v8  ;;  %v2959_v8 = vld [vmem:[#allocation22_spill] sm:$0xff] }
 0x655   :  { %1404 = vmatpush1.bf16.msra.mxu0 %v2769_v34  ;;  %1445 = vmatpush1.bf16.msra.mxu1 %v2165_v12 }
 0x656   :  { %1405 = vmatprep.subr.bf16.mxu0 %v2773_v35  ;;  %1446 = vmatprep.subr.bf16.mxu1 %v2166_v13 }
 0x659   :  { %1406 = vmatpush1.bf16.msra.mxu0 %v2777_v36  ;;  %1447 = vmatpush1.bf16.msra.mxu1 %v2167_v11  ;;  %v2955_v36 = vld [vmem:[#allocation20_spill] sm:$0xff] }
 0x65a   :  { %1407 = vmatprep.subr.bf16.mxu0 %v2781_v37  ;;  %1448 = vmatprep.subr.bf16.mxu1 %v2168_v30 }
 0x65d   :  { %1408 = vmatpush1.bf16.msra.mxu0 %v2785_v38  ;;  %1449 = vmatpush1.bf16.msra.mxu1 %v2169_v31  ;;  %v2956_v38 = vld [vmem:[#allocation29_spill] sm:$0xff] }
 0x65e   :  { %1871 = vmatprep.subr.bf16.mxu0 %v1970_v32 }
 0x700   :  { %v1307_v33 = vpop.f32.mrf.mxu0  ;;  %v1348_v34 = vpop.f32.mrf.mxu1 }
 0x701   :  { %v1355_v35 = vadd.f32 %v1307_v33, %v2954_v39  ;;  %v1357_v26 = vadd.f32 %v1348_v34, %v2957_v43 }
 0x702   :  { %v1309_v40 = vpop.f32.mrf.mxu0  ;;  %v1350_v41 = vpop.f32.mrf.mxu1 }
 0x703   :  { %v1844_v52 = vmul.f32 -1.442695, %v1355_v35  ;;  %v1356_v42 = vadd.f32 %v1309_v40, %v2955_v36  ;;  %v1358_v24 = vadd.f32 %v1350_v41, %v2956_v38  ;;  %v1850_v40 = vld [vmem:[%s2922_s5] ss:$0 sm:$0xff]  ;;  %s2264_s5 = smov [#allocation10]  }
 0x704   :  { %v1311_v16 = vpop.f32.mrf.mxu0  ;;  %v1352_v18 = vpop.f32.mrf.mxu1  ;;  %s1754_s23 = sshll.u32 %s2264_s5, 4  ;;  %s1755_s23 = int_to_ptr.vmem [resolvable:$true] %s1754_s23 }
 0x705   :  { %2074 = vpow2.f32 %v1844_v52  ;;  %v1845_v37 = vmul.f32 -1.442695, %v1356_v42  ;;  %v1846_v14 = vmul.f32 -1.442695, %v1358_v24  ;;  %s2230_s24 = scalar_lea.vmem %s1755_s23, 1024  ;;  %p2235_p2 = scmp.lt.s32.totalorder %s1755_s23, %s1755_s23 }
 0x706   :  { %v1312_v20 = vpop.f32.mrf.mxu0  ;;  %v1353_v22 = vpop.f32.mrf.mxu1  ;;  %p2231_p1 = scmp.ne.s32.totalorder %s1755_s23, %s2230_s24  ;;  %p2236_p3 = scmp.lt.s32.totalorder %s2230_s24, %s2230_s24 }
 0x707   :  { %2076 = vpow2.f32 %v1845_v37 }
 0x708   :  { %2078 = vtanh.f32 %v1357_v26  ;;  %p2237_p4 = por %p2236_p3, %p2235_p2 }
 0x709   :  { %2080 = vpow2.f32 %v1846_v14 }
 0x70a   :  { %p2238_p5 = pnand %p2237_p4, %p2231_p1 }
 0x712   :  { %v2075_v27 = vpop.eup %2074 }
 0x713   :  { %v1362_v56 = vadd.f32 1.0, %v2075_v27 }
 0x714   :  { %v2077_v44 = vpop.eup %2076 }
 0x715   :  { %2082 = vrcp.f32 %v1362_v56  ;;  %v1368_v15 = vadd.f32 1.0, %v2077_v44  ;;  %v2079_v29 = vpop.eup %2078 }
 0x716   :  { %v2081_v0 = vpop.eup %2080 }
 0x717   :  { %2084 = vrcp.f32 %v1368_v15  ;;  %v1375_v45 = vadd.f32 1.0, %v2081_v0 }
 0x719   :  { %2086 = vrcp.f32 %v1375_v45 }
 0x722   :  { %v2083_v28 = vpop.eup %2082 }
 0x723   :  { %v1379_v7 = vmul.f32 %v2083_v28, %v2079_v29 }
 0x724   :  { %v2085_v55 = vpop.eup %2084 }
 0x725   :  { %v1378_v57 = vmul.f32 %v2085_v55, %v2795_v63  ;;  %v1972_v63 = vld [vmem:[#allocation9 + $0x28] sm:$0xff]  }
 0x726   :  { %v2087_v23 = vpop.eup %2086 }
 0x727   :  { %v2824_v2 = vadd.f32 %v1379_v7, %v1378_v57 }
 0x729   :  { %2088 = vtanh.f32 %v2824_v2 }
 0x736   :  { %v2089_v50 = vpop.eup %2088 }
 0x737   :  { %v2827_v9 = vmul.f32 %v2089_v50, %v2087_v23 }
 0x739   :  { %v1385_v58 = vpack.c.bf16 %v2827_v9, %v2827_v9 }
 0x73b   :  { %1426 = vmatmul.mubr.bf16.vlgmr.msra.gmra.mxu0 %v1385_v58  ;;  %1467 = vmatmul.mubr.bf16.vlgmr.msra.gmra.mxu1 %v1385_v58 }
 0x73c   :  { %1872 = vmatpush3.bf16.msra.mxu0 %v1970_v32  ;;  %1887 = vmatprep.mubr.bf16.mxu0 %v1513_v54 }
 0x73d   :  { %1873 = vmatprep.subr.bf16.mxu0 %v1971_v48 }
 0x740   :  { %1874 = vmatpush3.bf16.msra.mxu0 %v1971_v48 }
 0x741   :  { %1875 = vmatprep.subr.bf16.mxu0 %v1972_v63 }
 0x744   :  { %1876 = vmatpush3.bf16.msra.mxu0 %v1972_v63 }
 0x745   :  { %1877 = vmatprep.subr.bf16.mxu0 %v1973_v59 }
 0x748   :  { %1878 = vmatpush3.bf16.msra.mxu0 %v1973_v59 }
 0x749   :  { %1879 = vmatprep.subr.bf16.mxu0 %v1974_v53 }
 0x74c   :  { %1880 = vmatpush3.bf16.msra.mxu0 %v1974_v53 }
 0x74d   :  { %1881 = vmatprep.subr.bf16.mxu0 %v1975_v47 }
 0x750   :  { %1882 = vmatpush3.bf16.msra.mxu0 %v1975_v47 }
 0x751   :  { %1883 = vmatprep.subr.bf16.mxu0 %v1976_v3 }
 0x754   :  { %1884 = vmatpush3.bf16.msra.mxu0 %v1976_v3 }
 0x755   :  { %1885 = vmatprep.subr.bf16.mxu0 %v1977_v21 }
 0x758   :  { %1886 = vmatpush3.bf16.msra.mxu0 %v1977_v21 }
 0x75b   :  { %1888 = vmatmul.mubr.bf16.vlgmr.msra.gmra.mxu0 %v1514_v51 }
 0x75c   :  { %1891 = vmatprep.mubr.bf16.mxu0 %v1515_v60 }
 0x7fb   :  { %v1427_v17 = vpop.f32.mrf.mxu0  ;;  %v1468_v19 = vpop.f32.mrf.mxu1 }
 0x7fc   :  { %v1475_v46 = vadd.f32 %v1427_v17, %v2958_v4  ;;  %v1477_v61 = vadd.f32 %v1468_v19, %v2960_v62 }
 0x7fd   :  { %v1429_v1 = vpop.f32.mrf.mxu0  ;;  %v1470_v49 = vpop.f32.mrf.mxu1 }
 0x7fe   :  { %v1847_v6 = vmul.f32 -1.442695, %v1475_v46  ;;  %v1476_v12 = vadd.f32 %v1429_v1, %v2959_v8  ;;  %v1478_v5 = vadd.f32 %v1470_v49, %v2532_v10 }
 0x7ff   :  { %v1431_v13 = vpop.f32.mrf.mxu0  ;;  %v1472_v11 = vpop.f32.mrf.mxu1 }
 0x800   :  { %2090 = vpow2.f32 %v1847_v6  ;;  %v1848_v30 = vmul.f32 -1.442695, %v1476_v12  ;;  %v1849_v32 = vmul.f32 -1.442695, %v1478_v5 }
 0x801   :  { %v1432_v31 = vpop.f32.mrf.mxu0  ;;  %v1473_v25 = vpop.f32.mrf.mxu1 }
 0x802   :  { %2092 = vpow2.f32 %v1848_v30 }
 0x803   :  { %2094 = vtanh.f32 %v1477_v61 }
 0x804   :  { %2096 = vpow2.f32 %v1849_v32 }
 0x80d   :  { %v2091_v33 = vpop.eup %2090 }
 0x80e   :  { %v1482_v34 = vadd.f32 1.0, %v2091_v33 }
 0x80f   :  { %v2093_v39 = vpop.eup %2092 }
 0x810   :  { %2098 = vrcp.f32 %v1482_v34  ;;  %v1488_v35 = vadd.f32 1.0, %v2093_v39  ;;  %v2095_v41 = vpop.eup %2094 }
 0x811   :  { %v2097_v36 = vpop.eup %2096 }
 0x812   :  { %2100 = vrcp.f32 %v1488_v35  ;;  %v1495_v22 = vadd.f32 1.0, %v2097_v36 }
 0x814   :  { %2102 = vrcp.f32 %v1495_v22 }
 0x81b   :  { %v1889_v52 = vpop.f32.mrf.mxu0 }
 0x81c   :  { %v2844_v42 = vadd.f32 %v1889_v52, %v1850_v40 }
 0x81d   :  { %v2099_v10 = vpop.eup %2098  ;;  %v1622_v16 = vpop.f32.mrf.mxu0 }
 0x81e   :  { %v1499_v18 = vmul.f32 %v2099_v10, %v2095_v41  ;;  %v2846_v37 = vadd.f32 %v1850_v40, %v1622_v16  ;;  %1657 = vmax.xlane.f32.xlu1 %v2844_v42 }
 0x81f   :  { %v2101_v20 = vpop.eup %2100  ;;  %v1890_v38 = vpop.f32.mrf.mxu0 }
 0x820   :  { %v1498_v24 = vmul.f32 %v2101_v20, %v2824_v2  ;;  %v2850_v43 = vadd.f32 %v1890_v38, %v1850_v40  ;;  %1653 = vmax.xlane.f32.xlu0 %v2846_v37 }
 0x821   :  { %v1625_v26 = vpop.f32.mrf.mxu0  ;;  %v2103_v56 = vpop.eup %2102 }
 0x822   :  { %v2853_v14 = vadd.f32 %v1850_v40, %v1625_v26  ;;  %1659 = vmax.xlane.f32.xlu1 %v2850_v43  ;;  %v1500_v27 = vadd.f32 %v1499_v18, %v1498_v24 }
 0x824   :  { %1655 = vmax.xlane.f32.xlu0 %v2853_v14  ;;  %2104 = vtanh.f32 %v1500_v27 }
 0x831   :  { %v2105_v44 = vpop.eup %2104 }
 0x832   :  { %v1502_v15 = vmul.f32 %v2105_v44, %v2103_v56 }
 0x834   :  { %v1516_v29 = vpack.c.bf16 %v1502_v15, %v2827_v9 }
 0x836   :  { %1892 = vmatmul.mubr.bf16.gmra.mxu0 %v1516_v29 }
 0x8a7   :  { %v2860_v28 = vpop.xlane.xlu1 %1657 }
 0x8a8   :  { %v1671_v45 = vsub.f32 %v2844_v42, %v2860_v28 }
 0x8a9   :  { %v2858_v0 = vpop.xlane.xlu0 %1653 }
 0x8aa   :  { %v1669_v7 = vsub.f32 %v2846_v37, %v2858_v0  ;;  %v1681_v50 = vmul.f32 1.442695, %v1671_v45 }
 0x8ab   :  { %v2870_v23 = vpop.xlane.xlu1 %1659 }
 0x8ac   :  { %v1677_v57 = vmul.f32 1.442695, %v1669_v7  ;;  %v1672_v9 = vsub.f32 %v2850_v43, %v2870_v23 }
 0x8ad   :  { %v2864_v55 = vpop.xlane.xlu0 %1655 }
 0x8ae   :  { %v1670_v2 = vsub.f32 %v2853_v14, %v2864_v55  ;;  %2106 = vpow2.f32 %v1677_v57  ;;  %v1683_v63 = vmul.f32 1.442695, %v1672_v9 }
 0x8af   :  { %2108 = vpow2.f32 %v1681_v50 }
 0x8b0   :  { %v1679_v58 = vmul.f32 1.442695, %v1670_v2 }
 0x8b2   :  { %2110 = vpow2.f32 %v1679_v58 }
 0x8b3   :  { %2112 = vpow2.f32 %v1683_v63 }
 0x8bb   :  { %v2107_v60 = vpop.eup %2106 }
 0x8bc   :  { %v2109_v17 = vpop.eup %2108 }
 0x8bf   :  { %v2111_v19 = vpop.eup %2110 }
 0x8c0   :  { %v2113_v4 = vpop.eup %2112 }
 0x8f6   :  { %v1893_v48 = vpop.f32.mrf.mxu0 }
 0x8f7   :  { %v2877_v3 = vadd.f32 %v1893_v48, %v1850_v40 }
 0x8f8   :  { %v1638_v54 = vpop.f32.mrf.mxu0 }
 0x8f9   :  { %v2874_v59 = vadd.f32 %v1850_v40, %v1638_v54 }
 0x8fa   :  { %v1894_v53 = vpop.f32.mrf.mxu0 }
 0x8fb   :  { %1661 = vmax.xlane.f32.xlu0 %v2874_v59  ;;  %v2883_v51 = vadd.f32 %v1894_v53, %v1850_v40 }
 0x8fc   :  { %v1641_v47 = vpop.f32.mrf.mxu0 }
 0x8fd   :  { %v2879_v21 = vadd.f32 %v1850_v40, %v1641_v47 }
 0x8ff   :  { %1663 = vmax.xlane.f32.xlu1 %v2879_v21  ;;  %1665 = vmax.xlane.f32.xlu0 %v2877_v3 }
 0x903   :  { %1667 = vmax.xlane.f32.xlu1 %v2883_v51  ;;  %1693 = vadd.xlane.f32.xlu0 %v2107_v60 }
 0x907   :  { %1697 = vadd.xlane.f32.xlu0 %v2109_v17  ;;  %1695 = vadd.xlane.f32.xlu1 %v2111_v19 }
 0x90b   :  { %1699 = vadd.xlane.f32.xlu1 %v2113_v4 }
 0x984   :  { %v1662_v46 = vpop.xlane.xlu0 %1661 }
 0x985   :  { %v1673_v1 = vsub.f32 %v2874_v59, %v1662_v46 }
 0x987   :  { %v1685_v49 = vmul.f32 1.442695, %v1673_v1 }
 0x988   :  { %v2887_v6 = vpop.xlane.xlu1 %1663  ;;  %v2889_v8 = vpop.xlane.xlu0 %1665 }
 0x989   :  { %2114 = vpow2.f32 %v1685_v49  ;;  %v1674_v12 = vsub.f32 %v2879_v21, %v2887_v6  ;;  %v1675_v13 = vsub.f32 %v2877_v3, %v2889_v8 }
 0x98b   :  { %v1687_v11 = vmul.f32 1.442695, %v1674_v12  ;;  %v1689_v30 = vmul.f32 1.442695, %v1675_v13 }
 0x98c   :  { %v2895_v31 = vpop.xlane.xlu1 %1667  ;;  %v1694_v25 = vpop.xlane.xlu0 %1693 }
 0x98d   :  { %2116 = vpow2.f32 %v1687_v11  ;;  %v1676_v5 = vsub.f32 %v2883_v51, %v2895_v31 }
 0x98e   :  { %2118 = vpow2.f32 %v1689_v30 }
 0x98f   :  { %v1691_v62 = vmul.f32 1.442695, %v1676_v5  ;;  %2120 = vlog2.f32 %v1694_v25 }
 0x990   :  { %v1696_v61 = vpop.xlane.xlu1 %1695  ;;  %v1698_v32 = vpop.xlane.xlu0 %1697 }
 0x991   :  { %2122 = vpow2.f32 %v1691_v62 }
 0x992   :  { %2124 = vlog2.f32 %v1696_v61 }
 0x993   :  { %2126 = vlog2.f32 %v1698_v32 }
 0x994   :  { %v1700_v33 = vpop.xlane.xlu1 %1699 }
 0x995   :  { %2128 = vlog2.f32 %v1700_v33 }
 0x996   :  { %v2115_v34 = vpop.eup %2114 }
 0x997   :  { %1701 = vadd.xlane.f32.xlu0 %v2115_v34 }
 0x99a   :  { %v2117_v39 = vpop.eup %2116 }
 0x99b   :  { %v2119_v35 = vpop.eup %2118  ;;  %1703 = vadd.xlane.f32.xlu1 %v2117_v39 }
 0x99c   :  { %v2121_v40 = vpop.eup %2120  ;;  %1705 = vadd.xlane.f32.xlu0 %v2119_v35 }
 0x99d   :  { %v1710_v41 = vmul.f32 0.6931472, %v2121_v40 }
 0x99e   :  { %v2123_v52 = vpop.eup %2122 }
 0x99f   :  { %v2125_v36 = vpop.eup %2124  ;;  %v1725_v10 = vadd.f32 %v1710_v41, %v2858_v0  ;;  %1707 = vadd.xlane.f32.xlu1 %v2123_v52 }
 0x9a0   :  { %v2127_v16 = vpop.eup %2126  ;;  %v1712_v18 = vmul.f32 0.6931472, %v2125_v36 }
 0x9a1   :  { %v1733_v20 = vsub.f32 %v2846_v37, %v1725_v10  ;;  %v1714_v22 = vmul.f32 0.6931472, %v2127_v16 }
 0x9a2   :  { %v2129_v38 = vpop.eup %2128  ;;  %v1726_v24 = vadd.f32 %v1712_v18, %v2864_v55 }
 0x9a3   :  { %1741 = vst [vmem:[#allocation10] sm:$0xff] %v1733_v20  ;;  %v1727_v26 = vadd.f32 %v1714_v22, %v2860_v28  ;;  %v1716_v27 = vmul.f32 0.6931472, %v2129_v38 }
 0x9a4   :  { %v1734_v56 = vsub.f32 %v2853_v14, %v1726_v24 }
 0x9a5   :  { %v1735_v44 = vsub.f32 %v2844_v42, %v1727_v26  ;;  %v1728_v15 = vadd.f32 %v1716_v27, %v2870_v23 }
 0x9a6   :  { %1742 = vst [vmem:[#allocation10 + $0x8] sm:$0xff] %v1734_v56 }
 0x9a7   :  { %1743 = vst [vmem:[#allocation10 + $0x10] sm:$0xff] %v1735_v44  ;;  %v1736_v29 = vsub.f32 %v2850_v43, %v1728_v15 }
 0x9a9   :  { %1744 = vst [vmem:[#allocation10 + $0x18] sm:$0xff] %v1736_v29 }
 0xa20   :  { %v1702_v37 = vpop.xlane.xlu0 %1701 }
 0xa21   :  { %2130 = vlog2.f32 %v1702_v37 }
 0xa24   :  { %v1704_v0 = vpop.xlane.xlu1 %1703 }
 0xa25   :  { %2132 = vlog2.f32 %v1704_v0  ;;  %v1706_v7 = vpop.xlane.xlu0 %1705 }
 0xa26   :  { %2134 = vlog2.f32 %v1706_v7 }
 0xa28   :  { %v1708_v55 = vpop.xlane.xlu1 %1707 }
 0xa29   :  { %2136 = vlog2.f32 %v1708_v55 }
 0xa2e   :  { %v2131_v28 = vpop.eup %2130 }
 0xa2f   :  { %v1718_v45 = vmul.f32 0.6931472, %v2131_v28 }
 0xa31   :  { %v1729_v14 = vadd.f32 %v1718_v45, %v1662_v46 }
 0xa32   :  { %v2133_v57 = vpop.eup %2132 }
 0xa33   :  { %v2135_v42 = vpop.eup %2134  ;;  %v1737_v2 = vsub.f32 %v2874_v59, %v1729_v14  ;;  %v1720_v23 = vmul.f32 0.6931472, %v2133_v57 }
 0xa34   :  { %v1722_v50 = vmul.f32 0.6931472, %v2135_v42 }
 0xa35   :  { %1745 = vst [vmem:[#allocation10 + $0x20] sm:$0xff] %v1737_v2  ;;  %v1730_v43 = vadd.f32 %v1720_v23, %v2887_v6 }
 0xa36   :  { %v2137_v9 = vpop.eup %2136  ;;  %v1731_v58 = vadd.f32 %v1722_v50, %v2889_v8 }
 0xa37   :  { %v1738_v48 = vsub.f32 %v2879_v21, %v1730_v43  ;;  %v1724_v54 = vmul.f32 0.6931472, %v2137_v9 }
 0xa38   :  { %v1739_v63 = vsub.f32 %v2877_v3, %v1731_v58 }
 0xa39   :  { %1746 = vst [vmem:[#allocation10 + $0x28] sm:$0xff] %v1738_v48  ;;  %v1732_v53 = vadd.f32 %v1724_v54, %v2895_v31 }
 0xa3a   :  { %1747 = vst [vmem:[#allocation10 + $0x30] sm:$0xff] %v1739_v63 }
 0xa3b   :  { %v1740_v59 = vsub.f32 %v2883_v51, %v1732_v53 }
 0xa3d   :  { %1748 = vst [vmem:[#allocation10 + $0x38] sm:$0xff] %v1740_v59 }
 0xa3e   :  { %2241 = shalt.err (!%p2238_p5)
}
 0xa3f   :  { %s2265_s25 = smov 128   ;;  %s2266_s26 = smov 8  }
 0xa40   :  { %1760 = dma.vmem_to_hbm [thread:$0]  %s1755_s23, 1024, %s2923_s6, [#allocation6], %s2265_s25, %s2265_s25, %s2266_s26  }
 0xa41   :  { %2254 = dma.done.wait [#allocation6], 1024  }
 0xa42   :  { %2255 = vsyncadd [#allocation6], 4294966272 }
 0xa43   :  { %1764 = vsyncpa [#allocation5], 1 }
 0xa44   :  { %1765 = vsyncpa [#allocation8], 1 }
 0xa45   :  { %1766 = vsyncpa [#allocation6], 1 }

</bundles_post_ra>
